<compile_context>
chip_gen: v6e
topology: v6e:2x2x1
jax: 0.10.0
libtpu: 0.0.40
codegen_flags: <defaults>
</compile_context>

<pallas_src>
import functools
import math

import jax
import jax.numpy as jnp
import numpy as np
from jax.experimental import pallas as pl
from jax.experimental.pallas import tpu as pltpu


_C = 10            # conv channels / classes
_CPAD = 16         # lane padding per spatial block in the Linear operand
_K = 3             # conv kernel size
_S = 2             # conv stride
_OH1 = _OW1 = 11   # conv1 output spatial (from 23x23 input)
_OH2 = _OW2 = 5    # conv2 output spatial
_SLOPE = 0.02      # LeakyReLU negative slope (per source)
_EPS = 1e-5        # BatchNorm eps

# Parity-grouped conv1-output row layout (rows ordered (oh//2, ow//2, b) inside
# each (oh%2, ow%2) group).  Offsets/sizes are in units of N rows.
_G_BASE = {(0, 0): 0, (0, 1): 36, (1, 0): 66, (1, 1): 96}   # group row offsets
_G_W = {0: 6, 1: 5}                                         # ow//2 count per col parity


# ---------------------------------------------------------------------------
# Pallas kernel: the whole Classifier forward, fused
# ---------------------------------------------------------------------------

def _classifier_fused_kernel(p1_ref, w1_ref, w2_ref, w3_ref, cp_ref,
                             o_ref, p2_ref, lin_ref, *, n):
    """Whole Classifier forward on VMEM-resident values.

    p1_ref : [n*121, 9]        conv1 im2col patches, parity-grouped row order
    w1_ref : [9, 10]           conv1 weight, rows (kh, kw)
    w2_ref : [90, 10]          conv2 weight, rows (tap=kh*3+kw, cin)
    w3_ref : [400, 10]         linear weight, rows (p=h*5+w, c) padded to 16/c-block
    cp_ref : [7, 10]           rows: b1, g1, beta1, b2, g2, beta2, b3
    o_ref  : [n, 10]           sigmoid outputs
    p2_ref : [n*25, 90]        scratch: conv2 patch matrix (depth-90 contraction)
    lin_ref: [n, 400]          scratch: lane-dense Linear operand
    """
    f32 = jnp.float32

    cp = cp_ref[...]
    b1, g1, bt1 = cp[0:1, :], cp[1:2, :], cp[2:3, :]
    b2, g2, bt2 = cp[3:4, :], cp[4:5, :], cp[5:6, :]
    b3 = cp[6:7, :]

    # ---- Conv1 (1->10, k3, s2) + LeakyReLU + BatchNorm (one-pass stats) ------
    y1 = jnp.dot(p1_ref[...], w1_ref[...], preferred_element_type=f32) + b1
    y1 = jnp.where(y1 >= 0.0, y1, _SLOPE * y1)
    m1 = jnp.mean(y1, axis=0, keepdims=True)
    yc1 = y1 - m1                                           # centered, reused
    v1 = jnp.mean(yc1 * yc1, axis=0, keepdims=True)
    y1n = yc1 * (jax.lax.rsqrt(v1 + _EPS) * g1) + bt1       # [121n, 10]

    # ---- Conv2 (10->10, k3, s2): assemble [25n, 90] patches, ONE deep matmul --
    # For tap (kh, kw) the needed y1 rows per conv2 output row i are a single
    # contiguous slice (thanks to the parity-grouped row order), stored into the
    # tap's 10-lane block of the patch scratch.  Only the 25 needed output
    # positions per image are ever computed.
    for kh in range(_K):
        for kw in range(_K):
            tap = kh * _K + kw
            khp, kh2 = kh & 1, kh >> 1
            kwp, kw2 = kw & 1, kw >> 1
            base = _G_BASE[(khp, kwp)] * n
            wg = _G_W[kwp]
            for i in range(_OH2):
                src = base + ((i + kh2) * wg + kw2) * n
                p2_ref[i * _OW2 * n:(i + 1) * _OW2 * n,
                       tap * _C:(tap + 1) * _C] = y1n[src:src + _OW2 * n, :]

    y2 = jnp.dot(p2_ref[...], w2_ref[...], preferred_element_type=f32) + b2
    y2 = jnp.where(y2 >= 0.0, y2, _SLOPE * y2)
    m2 = jnp.mean(y2, axis=0, keepdims=True)
    yc2 = y2 - m2
    v2 = jnp.mean(yc2 * yc2, axis=0, keepdims=True)
    y2n = yc2 * (jax.lax.rsqrt(v2 + _EPS) * g2) + bt2       # [25n, 10], rows (p, b)

    # ---- View(250) + Linear(250->10) as ONE matmul + Sigmoid ------------------
    # Lane-dense [n, 25*16] operand: block p holds the 10 channels of spatial
    # position p; padding lanes are zeroed and match zero weight rows.
    lin_ref[...] = jnp.zeros_like(lin_ref)
    for p in range(_OH2 * _OW2):
        lin_ref[:, p * _CPAD:p * _CPAD + _C] = y2n[p * n:(p + 1) * n, :]
    logits = jnp.dot(lin_ref[...], w3_ref[...], preferred_element_type=f32) + b3
    o_ref[...] = 0.5 * jnp.tanh(0.5 * logits) + 0.5         # exact sigmoid


# ---------------------------------------------------------------------------
# JAX glue: conv1 im2col (parity-grouped rows), weight layout, forward wrapper
# ---------------------------------------------------------------------------

def _conv1_patches_grouped(x_nchw):
    """[N,1,23,23] -> [121N, 9] conv1 patches, parity-grouped rows.

    Row order: groups (oh%2, ow%2) in (0,0),(0,1),(1,0),(1,1) order; within a
    group rows are (oh//2, ow//2, b).  Column order is (kh, kw).  This makes
    every conv2 receptive-field gather inside the kernel a contiguous static
    row slice (no strided slicing, no O(N^2) selection).
    """
    x = x_nchw[:, 0, :, :]                                  # [N, 23, 23]
    taps = []
    for kh in range(_K):
        for kw in range(_K):
            taps.append(x[:, kh:kh + _S * _OH1 - 1:_S, kw:kw + _S * _OW1 - 1:_S])
    p = jnp.stack(taps, axis=-1)                            # [N, 11, 11, 9]
    p = jnp.transpose(p, (1, 2, 0, 3))                      # [11, 11, N, 9]
    groups = []
    for ohp in range(2):
        for owp in range(2):
            groups.append(p[ohp::2, owp::2].reshape(-1, _K * _K))
    return jnp.concatenate(groups, axis=0)                  # [121N, 9]


def _prepare_operands(params):
    """One-time weight layout conversion (outside the hot path)."""
    # conv weights: OIHW -> rows (kh, kw[, cin]) x cols cout.
    w1m = jnp.transpose(params["w1"], (2, 3, 1, 0)).reshape(_K * _K, _C)
    w2m = jnp.transpose(params["w2"], (2, 3, 1, 0)).reshape(_K * _K * _C, _C)
    # Linear: torch columns are (c, h, w).  Reorder to rows (p=h*5+w, c) and pad
    # each spatial block to 16 rows (zeros) to match the kernel's lane-dense
    # operand layout; zero rows contribute nothing to the dot.
    w3r = jnp.transpose(params["w3"].T.reshape(_C, _OH2 * _OW2, _C), (1, 0, 2))
    w3m = jnp.pad(w3r, ((0, 0), (0, _CPAD - _C), (0, 0))).reshape(
        _OH2 * _OW2 * _CPAD, _C)                            # [400, 10]
    cp = jnp.stack([params["b1"], params["bn1_g"], params["bn1_b"],
                    params["b2"], params["bn2_g"], params["bn2_b"],
                    params["b3"]], axis=0)                  # [7, 10]
    return w1m, w2m, w3m, cp


def init_params(key):
    """Deterministic parameter init (PyTorch-style uniform bounds)."""
    ks = jax.random.split(key, 6)

    def u(k, shape, fan_in):
        b = 1.0 / math.sqrt(fan_in)
        return jax.random.uniform(k, shape, jnp.float32, -b, b)

    return {
        "w1": u(ks[0], (_C, 1, _K, _K), 1 * _K * _K),
        "b1": u(ks[1], (_C,), 1 * _K * _K),
        "bn1_g": jnp.ones((_C,), jnp.float32),
        "bn1_b": jnp.zeros((_C,), jnp.float32),
        "w2": u(ks[2], (_C, _C, _K, _K), _C * _K * _K),
        "b2": u(ks[3], (_C,), _C * _K * _K),
        "bn2_g": jnp.ones((_C,), jnp.float32),
        "bn2_b": jnp.zeros((_C,), jnp.float32),
        "w3": u(ks[4], (_C, _C * _OH2 * _OW2), _C * _OH2 * _OW2),   # [out, in]
        "b3": u(ks[5], (_C,), _C * _OH2 * _OW2),
    }


@jax.jit
def classifier_forward(x_nchw, params):
    """Forward pass of Classifier.  x_nchw: [N, 1, 23, 23] float32 -> [N, 10]."""
    n = x_nchw.shape[0]
    r1, r2 = n * _OH1 * _OW1, n * _OH2 * _OW2
    p1 = _conv1_patches_grouped(x_nchw)
    w1m, w2m, w3m, cp = _prepare_operands(params)

    flops = (2 * r1 * (_K * _K) * _C                    # conv1
             + 2 * r2 * (_K * _K * _C) * _C             # conv2 (depth-90 matmul)
             + 2 * n * (_OH2 * _OW2 * _CPAD) * _C)      # linear (padded depth)
    cost = pl.CostEstimate(
        flops=flops,
        transcendentals=n * _C + 4 * _C,
        bytes_accessed=4 * (r1 * _K * _K
                            + (_K * _K + _K * _K * _C + _OH2 * _OW2 * _CPAD + 7) * _C
                            + n * _C))

    return pl.pallas_call(
        functools.partial(_classifier_fused_kernel, n=n),
        out_shape=jax.ShapeDtypeStruct((n, _C), jnp.float32),
        in_specs=[pl.BlockSpec(memory_space=pltpu.MemorySpace.VMEM)] * 5,
        out_specs=pl.BlockSpec(memory_space=pltpu.MemorySpace.VMEM),
        scratch_shapes=[pltpu.VMEM((r2, _K * _K * _C), jnp.float32),
                        pltpu.VMEM((n, _OH2 * _OW2 * _CPAD), jnp.float32)],
        cost_estimate=cost,
    )(p1, w1m, w2m, w3m, cp)


# ---------------------------------------------------------------------------
# Pure-JAX reference (for correctness cross-check)
# ---------------------------------------------------------------------------

@jax.jit
def _reference_forward(x_nchw, params):
    n = x_nchw.shape[0]

    def bn(y, g, b):
        mean = y.mean(axis=(0, 2, 3), keepdims=True)
        var = jnp.square(y - mean).mean(axis=(0, 2, 3), keepdims=True)
        y = (y - mean) / jnp.sqrt(var + _EPS)
        return y * g[None, :, None, None] + b[None, :, None, None]

    y = jax.lax.conv_general_dilated(
        x_nchw, params["w1"], (_S, _S), "VALID",
        dimension_numbers=("NCHW", "OIHW", "NCHW"))
    y = y + params["b1"][None, :, None, None]
    y = jnp.where(y >= 0.0, y, _SLOPE * y)
    y = bn(y, params["bn1_g"], params["bn1_b"])

    y = jax.lax.conv_general_dilated(
        y, params["w2"], (_S, _S), "VALID",
        dimension_numbers=("NCHW", "OIHW", "NCHW"))
    y = y + params["b2"][None, :, None, None]
    y = jnp.where(y >= 0.0, y, _SLOPE * y)
    y = bn(y, params["bn2_g"], params["bn2_b"])

    flat = y.reshape(n, _C * _OH2 * _OW2)                   # NCHW flatten
    logits = flat @ params["w3"].T + params["b3"]
    return jax.nn.sigmoid(logits)


# ---------------------------------------------------------------------------
# Main
# ---------------------------------------------------------------------------

if __name__ == "__main__":
    key = jax.random.PRNGKey(0)
    k_in, k_par = jax.random.split(key)

    # 23x23 input -> conv1: 11x11 -> conv2: 5x5 -> 10*5*5 = 250 (matches View(250)).
    x = jax.random.normal(k_in, (2, 1, 23, 23), jnp.float32)
    params = init_params(k_par)

    out = jax.block_until_ready(classifier_forward(x, params))
    assert out.shape == (2, _C), out.shape
    assert np.isfinite(np.asarray(out)).all()

    ref = jax.block_until_ready(_reference_forward(x, params))
    err = float(jnp.max(jnp.abs(out - ref)))
    # tight tolerance: exact-sigmoid (tanh) path, only f32 accumulation-order noise
    assert err < 2e-4, f"max |pallas - reference| = {err}"

    print("KERNEL_OK")
</pallas_src>

<mosaic_0001>
module attributes {stable_mosaic.version = 11 : i64} {
  func.func @_classifier_fused_kernel(%arg0: memref<242x9xf32, #tpu.memory_space<vmem>>, %arg1: memref<9x10xf32, #tpu.memory_space<vmem>>, %arg2: memref<90x10xf32, #tpu.memory_space<vmem>>, %arg3: memref<400x10xf32, #tpu.memory_space<vmem>>, %arg4: memref<7x10xf32, #tpu.memory_space<vmem>>, %arg5: memref<2x10xf32, #tpu.memory_space<vmem>>, %arg6: memref<50x90xf32, #tpu.memory_space<vmem>>, %arg7: memref<2x400xf32, #tpu.memory_space<vmem>>) attributes {dimension_semantics = [], scalar_prefetch = 0 : i64, scratch_operands = 2 : i64, tpu.core_type = #tpu.core_type<tc>} {
    %c0 = arith.constant 0 : index
    %c0_0 = arith.constant 0 : index
    %0 = vector.load %arg4[%c0, %c0_0] : memref<7x10xf32, #tpu.memory_space<vmem>>, vector<7x10xf32>
    %1 = vector.extract_strided_slice %0 {offsets = [0, 0], sizes = [1, 10], strides = [1, 1]} : vector<7x10xf32> to vector<1x10xf32>
    %2 = vector.extract_strided_slice %0 {offsets = [1, 0], sizes = [1, 10], strides = [1, 1]} : vector<7x10xf32> to vector<1x10xf32>
    %3 = vector.extract_strided_slice %0 {offsets = [2, 0], sizes = [1, 10], strides = [1, 1]} : vector<7x10xf32> to vector<1x10xf32>
    %4 = vector.extract_strided_slice %0 {offsets = [3, 0], sizes = [1, 10], strides = [1, 1]} : vector<7x10xf32> to vector<1x10xf32>
    %5 = vector.extract_strided_slice %0 {offsets = [4, 0], sizes = [1, 10], strides = [1, 1]} : vector<7x10xf32> to vector<1x10xf32>
    %6 = vector.extract_strided_slice %0 {offsets = [5, 0], sizes = [1, 10], strides = [1, 1]} : vector<7x10xf32> to vector<1x10xf32>
    %7 = vector.extract_strided_slice %0 {offsets = [6, 0], sizes = [1, 10], strides = [1, 1]} : vector<7x10xf32> to vector<1x10xf32>
    %c0_1 = arith.constant 0 : index
    %c0_2 = arith.constant 0 : index
    %8 = vector.load %arg0[%c0_1, %c0_2] : memref<242x9xf32, #tpu.memory_space<vmem>>, vector<242x9xf32>
    %c0_3 = arith.constant 0 : index
    %c0_4 = arith.constant 0 : index
    %9 = vector.load %arg1[%c0_3, %c0_4] : memref<9x10xf32, #tpu.memory_space<vmem>>, vector<9x10xf32>
    %cst = arith.constant dense<0.000000e+00> : vector<242x10xf32>
    %10 = tpu.matmul %8, %9, %cst {dimension_numbers = #tpu.dot_dimension_numbers<[1], [0], [0], [1], [0, 0, 1, 1], [], []>} : vector<242x9xf32>, vector<9x10xf32>, vector<242x10xf32> -> vector<242x10xf32>
    %11 = vector.broadcast %1 : vector<1x10xf32> to vector<242x10xf32>
    %12 = arith.addf %10, %11 : vector<242x10xf32>
    %cst_5 = arith.constant 0.000000e+00 : f32
    %13 = vector.broadcast %cst_5 : f32 to vector<242x10xf32>
    %14 = arith.cmpf oge, %12, %13 : vector<242x10xf32>
    %cst_6 = arith.constant 2.000000e-02 : f32
    %15 = vector.broadcast %cst_6 : f32 to vector<242x10xf32>
    %16 = arith.mulf %15, %12 : vector<242x10xf32>
    %17 = arith.select %14, %12, %16 : vector<242x10xi1>, vector<242x10xf32>
    %cst_7 = arith.constant dense<0.000000e+00> : vector<10xf32>
    %18 = vector.multi_reduction <add>, %17, %cst_7 [0] : vector<242x10xf32> to vector<10xf32>
    %19 = vector.shape_cast %18 : vector<10xf32> to vector<1x10xf32>
    %cst_8 = arith.constant 2.420000e+02 : f32
    %20 = vector.broadcast %cst_8 : f32 to vector<1x10xf32>
    %21 = arith.divf %19, %20 : vector<1x10xf32>
    %22 = vector.broadcast %21 : vector<1x10xf32> to vector<242x10xf32>
    %23 = arith.subf %17, %22 : vector<242x10xf32>
    %24 = arith.mulf %23, %23 : vector<242x10xf32>
    %cst_9 = arith.constant dense<0.000000e+00> : vector<10xf32>
    %25 = vector.multi_reduction <add>, %24, %cst_9 [0] : vector<242x10xf32> to vector<10xf32>
    %26 = vector.shape_cast %25 : vector<10xf32> to vector<1x10xf32>
    %cst_10 = arith.constant 2.420000e+02 : f32
    %27 = vector.broadcast %cst_10 : f32 to vector<1x10xf32>
    %28 = arith.divf %26, %27 : vector<1x10xf32>
    %cst_11 = arith.constant 9.99999974E-6 : f32
    %29 = vector.broadcast %cst_11 : f32 to vector<1x10xf32>
    %30 = arith.addf %28, %29 : vector<1x10xf32>
    %31 = math.rsqrt %30 : vector<1x10xf32>
    %32 = arith.mulf %31, %2 : vector<1x10xf32>
    %33 = vector.broadcast %32 : vector<1x10xf32> to vector<242x10xf32>
    %34 = arith.mulf %23, %33 : vector<242x10xf32>
    %35 = vector.broadcast %3 : vector<1x10xf32> to vector<242x10xf32>
    %36 = arith.addf %34, %35 : vector<242x10xf32>
    %37 = vector.extract_strided_slice %36 {offsets = [0, 0], sizes = [10, 10], strides = [1, 1]} : vector<242x10xf32> to vector<10x10xf32>
    %c0_12 = arith.constant 0 : index
    %c0_13 = arith.constant 0 : index
    %38 = vector.load %arg6[%c0_12, %c0_13] : memref<50x90xf32, #tpu.memory_space<vmem>>, vector<10x10xf32>
    tpu.vector_store %arg6[%c0_12, %c0_13], %37 {strides = array<i32>} : memref<50x90xf32, #tpu.memory_space<vmem>>, vector<10x10xf32>,
    %39 = vector.extract_strided_slice %36 {offsets = [12, 0], sizes = [10, 10], strides = [1, 1]} : vector<242x10xf32> to vector<10x10xf32>
    %c10 = arith.constant 10 : index
    %c0_14 = arith.constant 0 : index
    %40 = vector.load %arg6[%c10, %c0_14] : memref<50x90xf32, #tpu.memory_space<vmem>>, vector<10x10xf32>
    tpu.vector_store %arg6[%c10, %c0_14], %39 {strides = array<i32>} : memref<50x90xf32, #tpu.memory_space<vmem>>, vector<10x10xf32>,
    %41 = vector.extract_strided_slice %36 {offsets = [24, 0], sizes = [10, 10], strides = [1, 1]} : vector<242x10xf32> to vector<10x10xf32>
    %c20 = arith.constant 20 : index
    %c0_15 = arith.constant 0 : index
    %42 = vector.load %arg6[%c20, %c0_15] : memref<50x90xf32, #tpu.memory_space<vmem>>, vector<10x10xf32>
    tpu.vector_store %arg6[%c20, %c0_15], %41 {strides = array<i32>} : memref<50x90xf32, #tpu.memory_space<vmem>>, vector<10x10xf32>,
    %43 = vector.extract_strided_slice %36 {offsets = [36, 0], sizes = [10, 10], strides = [1, 1]} : vector<242x10xf32> to vector<10x10xf32>
    %c30 = arith.constant 30 : index
    %c0_16 = arith.constant 0 : index
    %44 = vector.load %arg6[%c30, %c0_16] : memref<50x90xf32, #tpu.memory_space<vmem>>, vector<10x10xf32>
    tpu.vector_store %arg6[%c30, %c0_16], %43 {strides = array<i32>} : memref<50x90xf32, #tpu.memory_space<vmem>>, vector<10x10xf32>,
    %45 = vector.extract_strided_slice %36 {offsets = [48, 0], sizes = [10, 10], strides = [1, 1]} : vector<242x10xf32> to vector<10x10xf32>
    %c40 = arith.constant 40 : index
    %c0_17 = arith.constant 0 : index
    %46 = vector.load %arg6[%c40, %c0_17] : memref<50x90xf32, #tpu.memory_space<vmem>>, vector<10x10xf32>
    tpu.vector_store %arg6[%c40, %c0_17], %45 {strides = array<i32>} : memref<50x90xf32, #tpu.memory_space<vmem>>, vector<10x10xf32>,
    %47 = vector.extract_strided_slice %36 {offsets = [72, 0], sizes = [10, 10], strides = [1, 1]} : vector<242x10xf32> to vector<10x10xf32>
    %c0_18 = arith.constant 0 : index
    %c10_19 = arith.constant 10 : index
    %48 = vector.load %arg6[%c0_18, %c10_19] : memref<50x90xf32, #tpu.memory_space<vmem>>, vector<10x10xf32>
    tpu.vector_store %arg6[%c0_18, %c10_19], %47 {strides = array<i32>} : memref<50x90xf32, #tpu.memory_space<vmem>>, vector<10x10xf32>,
    %49 = vector.extract_strided_slice %36 {offsets = [82, 0], sizes = [10, 10], strides = [1, 1]} : vector<242x10xf32> to vector<10x10xf32>
    %c10_20 = arith.constant 10 : index
    %c10_21 = arith.constant 10 : index
    %50 = vector.load %arg6[%c10_20, %c10_21] : memref<50x90xf32, #tpu.memory_space<vmem>>, vector<10x10xf32>
    tpu.vector_store %arg6[%c10_20, %c10_21], %49 {strides = array<i32>} : memref<50x90xf32, #tpu.memory_space<vmem>>, vector<10x10xf32>,
    %51 = vector.extract_strided_slice %36 {offsets = [92, 0], sizes = [10, 10], strides = [1, 1]} : vector<242x10xf32> to vector<10x10xf32>
    %c20_22 = arith.constant 20 : index
    %c10_23 = arith.constant 10 : index
    %52 = vector.load %arg6[%c20_22, %c10_23] : memref<50x90xf32, #tpu.memory_space<vmem>>, vector<10x10xf32>
    tpu.vector_store %arg6[%c20_22, %c10_23], %51 {strides = array<i32>} : memref<50x90xf32, #tpu.memory_space<vmem>>, vector<10x10xf32>,
    %53 = vector.extract_strided_slice %36 {offsets = [102, 0], sizes = [10, 10], strides = [1, 1]} : vector<242x10xf32> to vector<10x10xf32>
    %c30_24 = arith.constant 30 : index
    %c10_25 = arith.constant 10 : index
    %54 = vector.load %arg6[%c30_24, %c10_25] : memref<50x90xf32, #tpu.memory_space<vmem>>, vector<10x10xf32>
    tpu.vector_store %arg6[%c30_24, %c10_25], %53 {strides = array<i32>} : memref<50x90xf32, #tpu.memory_space<vmem>>, vector<10x10xf32>,
    %55 = vector.extract_strided_slice %36 {offsets = [112, 0], sizes = [10, 10], strides = [1, 1]} : vector<242x10xf32> to vector<10x10xf32>
    %c40_26 = arith.constant 40 : index
    %c10_27 = arith.constant 10 : index
    %56 = vector.load %arg6[%c40_26, %c10_27] : memref<50x90xf32, #tpu.memory_space<vmem>>, vector<10x10xf32>
    tpu.vector_store %arg6[%c40_26, %c10_27], %55 {strides = array<i32>} : memref<50x90xf32, #tpu.memory_space<vmem>>, vector<10x10xf32>,
    %57 = vector.extract_strided_slice %36 {offsets = [2, 0], sizes = [10, 10], strides = [1, 1]} : vector<242x10xf32> to vector<10x10xf32>
    %c0_28 = arith.constant 0 : index
    %c20_29 = arith.constant 20 : index
    %58 = vector.load %arg6[%c0_28, %c20_29] : memref<50x90xf32, #tpu.memory_space<vmem>>, vector<10x10xf32>
    tpu.vector_store %arg6[%c0_28, %c20_29], %57 {strides = array<i32>} : memref<50x90xf32, #tpu.memory_space<vmem>>, vector<10x10xf32>,
    %59 = vector.extract_strided_slice %36 {offsets = [14, 0], sizes = [10, 10], strides = [1, 1]} : vector<242x10xf32> to vector<10x10xf32>
    %c10_30 = arith.constant 10 : index
    %c20_31 = arith.constant 20 : index
    %60 = vector.load %arg6[%c10_30, %c20_31] : memref<50x90xf32, #tpu.memory_space<vmem>>, vector<10x10xf32>
    tpu.vector_store %arg6[%c10_30, %c20_31], %59 {strides = array<i32>} : memref<50x90xf32, #tpu.memory_space<vmem>>, vector<10x10xf32>,
    %61 = vector.extract_strided_slice %36 {offsets = [26, 0], sizes = [10, 10], strides = [1, 1]} : vector<242x10xf32> to vector<10x10xf32>
    %c20_32 = arith.constant 20 : index
    %c20_33 = arith.constant 20 : index
    %62 = vector.load %arg6[%c20_32, %c20_33] : memref<50x90xf32, #tpu.memory_space<vmem>>, vector<10x10xf32>
    tpu.vector_store %arg6[%c20_32, %c20_33], %61 {strides = array<i32>} : memref<50x90xf32, #tpu.memory_space<vmem>>, vector<10x10xf32>,
    %63 = vector.extract_strided_slice %36 {offsets = [38, 0], sizes = [10, 10], strides = [1, 1]} : vector<242x10xf32> to vector<10x10xf32>
    %c30_34 = arith.constant 30 : index
    %c20_35 = arith.constant 20 : index
    %64 = vector.load %arg6[%c30_34, %c20_35] : memref<50x90xf32, #tpu.memory_space<vmem>>, vector<10x10xf32>
    tpu.vector_store %arg6[%c30_34, %c20_35], %63 {strides = array<i32>} : memref<50x90xf32, #tpu.memory_space<vmem>>, vector<10x10xf32>,
    %65 = vector.extract_strided_slice %36 {offsets = [50, 0], sizes = [10, 10], strides = [1, 1]} : vector<242x10xf32> to vector<10x10xf32>
    %c40_36 = arith.constant 40 : index
    %c20_37 = arith.constant 20 : index
    %66 = vector.load %arg6[%c40_36, %c20_37] : memref<50x90xf32, #tpu.memory_space<vmem>>, vector<10x10xf32>
    tpu.vector_store %arg6[%c40_36, %c20_37], %65 {strides = array<i32>} : memref<50x90xf32, #tpu.memory_space<vmem>>, vector<10x10xf32>,
    %67 = vector.extract_strided_slice %36 {offsets = [132, 0], sizes = [10, 10], strides = [1, 1]} : vector<242x10xf32> to vector<10x10xf32>
    %c0_38 = arith.constant 0 : index
    %c30_39 = arith.constant 30 : index
    %68 = vector.load %arg6[%c0_38, %c30_39] : memref<50x90xf32, #tpu.memory_space<vmem>>, vector<10x10xf32>
    tpu.vector_store %arg6[%c0_38, %c30_39], %67 {strides = array<i32>} : memref<50x90xf32, #tpu.memory_space<vmem>>, vector<10x10xf32>,
    %69 = vector.extract_strided_slice %36 {offsets = [144, 0], sizes = [10, 10], strides = [1, 1]} : vector<242x10xf32> to vector<10x10xf32>
    %c10_40 = arith.constant 10 : index
    %c30_41 = arith.constant 30 : index
    %70 = vector.load %arg6[%c10_40, %c30_41] : memref<50x90xf32, #tpu.memory_space<vmem>>, vector<10x10xf32>
    tpu.vector_store %arg6[%c10_40, %c30_41], %69 {strides = array<i32>} : memref<50x90xf32, #tpu.memory_space<vmem>>, vector<10x10xf32>,
    %71 = vector.extract_strided_slice %36 {offsets = [156, 0], sizes = [10, 10], strides = [1, 1]} : vector<242x10xf32> to vector<10x10xf32>
    %c20_42 = arith.constant 20 : index
    %c30_43 = arith.constant 30 : index
    %72 = vector.load %arg6[%c20_42, %c30_43] : memref<50x90xf32, #tpu.memory_space<vmem>>, vector<10x10xf32>
    tpu.vector_store %arg6[%c20_42, %c30_43], %71 {strides = array<i32>} : memref<50x90xf32, #tpu.memory_space<vmem>>, vector<10x10xf32>,
    %73 = vector.extract_strided_slice %36 {offsets = [168, 0], sizes = [10, 10], strides = [1, 1]} : vector<242x10xf32> to vector<10x10xf32>
    %c30_44 = arith.constant 30 : index
    %c30_45 = arith.constant 30 : index
    %74 = vector.load %arg6[%c30_44, %c30_45] : memref<50x90xf32, #tpu.memory_space<vmem>>, vector<10x10xf32>
    tpu.vector_store %arg6[%c30_44, %c30_45], %73 {strides = array<i32>} : memref<50x90xf32, #tpu.memory_space<vmem>>, vector<10x10xf32>,
    %75 = vector.extract_strided_slice %36 {offsets = [180, 0], sizes = [10, 10], strides = [1, 1]} : vector<242x10xf32> to vector<10x10xf32>
    %c40_46 = arith.constant 40 : index
    %c30_47 = arith.constant 30 : index
    %76 = vector.load %arg6[%c40_46, %c30_47] : memref<50x90xf32, #tpu.memory_space<vmem>>, vector<10x10xf32>
    tpu.vector_store %arg6[%c40_46, %c30_47], %75 {strides = array<i32>} : memref<50x90xf32, #tpu.memory_space<vmem>>, vector<10x10xf32>,
    %77 = vector.extract_strided_slice %36 {offsets = [192, 0], sizes = [10, 10], strides = [1, 1]} : vector<242x10xf32> to vector<10x10xf32>
    %c0_48 = arith.constant 0 : index
    %c40_49 = arith.constant 40 : index
    %78 = vector.load %arg6[%c0_48, %c40_49] : memref<50x90xf32, #tpu.memory_space<vmem>>, vector<10x10xf32>
    tpu.vector_store %arg6[%c0_48, %c40_49], %77 {strides = array<i32>} : memref<50x90xf32, #tpu.memory_space<vmem>>, vector<10x10xf32>,
    %79 = vector.extract_strided_slice %36 {offsets = [202, 0], sizes = [10, 10], strides = [1, 1]} : vector<242x10xf32> to vector<10x10xf32>
    %c10_50 = arith.constant 10 : index
    %c40_51 = arith.constant 40 : index
    %80 = vector.load %arg6[%c10_50, %c40_51] : memref<50x90xf32, #tpu.memory_space<vmem>>, vector<10x10xf32>
    tpu.vector_store %arg6[%c10_50, %c40_51], %79 {strides = array<i32>} : memref<50x90xf32, #tpu.memory_space<vmem>>, vector<10x10xf32>,
    %81 = vector.extract_strided_slice %36 {offsets = [212, 0], sizes = [10, 10], strides = [1, 1]} : vector<242x10xf32> to vector<10x10xf32>
    %c20_52 = arith.constant 20 : index
    %c40_53 = arith.constant 40 : index
    %82 = vector.load %arg6[%c20_52, %c40_53] : memref<50x90xf32, #tpu.memory_space<vmem>>, vector<10x10xf32>
    tpu.vector_store %arg6[%c20_52, %c40_53], %81 {strides = array<i32>} : memref<50x90xf32, #tpu.memory_space<vmem>>, vector<10x10xf32>,
    %83 = vector.extract_strided_slice %36 {offsets = [222, 0], sizes = [10, 10], strides = [1, 1]} : vector<242x10xf32> to vector<10x10xf32>
    %c30_54 = arith.constant 30 : index
    %c40_55 = arith.constant 40 : index
    %84 = vector.load %arg6[%c30_54, %c40_55] : memref<50x90xf32, #tpu.memory_space<vmem>>, vector<10x10xf32>
    tpu.vector_store %arg6[%c30_54, %c40_55], %83 {strides = array<i32>} : memref<50x90xf32, #tpu.memory_space<vmem>>, vector<10x10xf32>,
    %85 = vector.extract_strided_slice %36 {offsets = [232, 0], sizes = [10, 10], strides = [1, 1]} : vector<242x10xf32> to vector<10x10xf32>
    %c40_56 = arith.constant 40 : index
    %c40_57 = arith.constant 40 : index
    %86 = vector.load %arg6[%c40_56, %c40_57] : memref<50x90xf32, #tpu.memory_space<vmem>>, vector<10x10xf32>
    tpu.vector_store %arg6[%c40_56, %c40_57], %85 {strides = array<i32>} : memref<50x90xf32, #tpu.memory_space<vmem>>, vector<10x10xf32>,
    %87 = vector.extract_strided_slice %36 {offsets = [134, 0], sizes = [10, 10], strides = [1, 1]} : vector<242x10xf32> to vector<10x10xf32>
    %c0_58 = arith.constant 0 : index
    %c50 = arith.constant 50 : index
    %88 = vector.load %arg6[%c0_58, %c50] : memref<50x90xf32, #tpu.memory_space<vmem>>, vector<10x10xf32>
    tpu.vector_store %arg6[%c0_58, %c50], %87 {strides = array<i32>} : memref<50x90xf32, #tpu.memory_space<vmem>>, vector<10x10xf32>,
    %89 = vector.extract_strided_slice %36 {offsets = [146, 0], sizes = [10, 10], strides = [1, 1]} : vector<242x10xf32> to vector<10x10xf32>
    %c10_59 = arith.constant 10 : index
    %c50_60 = arith.constant 50 : index
    %90 = vector.load %arg6[%c10_59, %c50_60] : memref<50x90xf32, #tpu.memory_space<vmem>>, vector<10x10xf32>
    tpu.vector_store %arg6[%c10_59, %c50_60], %89 {strides = array<i32>} : memref<50x90xf32, #tpu.memory_space<vmem>>, vector<10x10xf32>,
    %91 = vector.extract_strided_slice %36 {offsets = [158, 0], sizes = [10, 10], strides = [1, 1]} : vector<242x10xf32> to vector<10x10xf32>
    %c20_61 = arith.constant 20 : index
    %c50_62 = arith.constant 50 : index
    %92 = vector.load %arg6[%c20_61, %c50_62] : memref<50x90xf32, #tpu.memory_space<vmem>>, vector<10x10xf32>
    tpu.vector_store %arg6[%c20_61, %c50_62], %91 {strides = array<i32>} : memref<50x90xf32, #tpu.memory_space<vmem>>, vector<10x10xf32>,
    %93 = vector.extract_strided_slice %36 {offsets = [170, 0], sizes = [10, 10], strides = [1, 1]} : vector<242x10xf32> to vector<10x10xf32>
    %c30_63 = arith.constant 30 : index
    %c50_64 = arith.constant 50 : index
    %94 = vector.load %arg6[%c30_63, %c50_64] : memref<50x90xf32, #tpu.memory_space<vmem>>, vector<10x10xf32>
    tpu.vector_store %arg6[%c30_63, %c50_64], %93 {strides = array<i32>} : memref<50x90xf32, #tpu.memory_space<vmem>>, vector<10x10xf32>,
    %95 = vector.extract_strided_slice %36 {offsets = [182, 0], sizes = [10, 10], strides = [1, 1]} : vector<242x10xf32> to vector<10x10xf32>
    %c40_65 = arith.constant 40 : index
    %c50_66 = arith.constant 50 : index
    %96 = vector.load %arg6[%c40_65, %c50_66] : memref<50x90xf32, #tpu.memory_space<vmem>>, vector<10x10xf32>
    tpu.vector_store %arg6[%c40_65, %c50_66], %95 {strides = array<i32>} : memref<50x90xf32, #tpu.memory_space<vmem>>, vector<10x10xf32>,
    %97 = vector.extract_strided_slice %36 {offsets = [12, 0], sizes = [10, 10], strides = [1, 1]} : vector<242x10xf32> to vector<10x10xf32>
    %c0_67 = arith.constant 0 : index
    %c60 = arith.constant 60 : index
    %98 = vector.load %arg6[%c0_67, %c60] : memref<50x90xf32, #tpu.memory_space<vmem>>, vector<10x10xf32>
    tpu.vector_store %arg6[%c0_67, %c60], %97 {strides = array<i32>} : memref<50x90xf32, #tpu.memory_space<vmem>>, vector<10x10xf32>,
    %99 = vector.extract_strided_slice %36 {offsets = [24, 0], sizes = [10, 10], strides = [1, 1]} : vector<242x10xf32> to vector<10x10xf32>
    %c10_68 = arith.constant 10 : index
    %c60_69 = arith.constant 60 : index
    %100 = vector.load %arg6[%c10_68, %c60_69] : memref<50x90xf32, #tpu.memory_space<vmem>>, vector<10x10xf32>
    tpu.vector_store %arg6[%c10_68, %c60_69], %99 {strides = array<i32>} : memref<50x90xf32, #tpu.memory_space<vmem>>, vector<10x10xf32>,
    %101 = vector.extract_strided_slice %36 {offsets = [36, 0], sizes = [10, 10], strides = [1, 1]} : vector<242x10xf32> to vector<10x10xf32>
    %c20_70 = arith.constant 20 : index
    %c60_71 = arith.constant 60 : index
    %102 = vector.load %arg6[%c20_70, %c60_71] : memref<50x90xf32, #tpu.memory_space<vmem>>, vector<10x10xf32>
    tpu.vector_store %arg6[%c20_70, %c60_71], %101 {strides = array<i32>} : memref<50x90xf32, #tpu.memory_space<vmem>>, vector<10x10xf32>,
    %103 = vector.extract_strided_slice %36 {offsets = [48, 0], sizes = [10, 10], strides = [1, 1]} : vector<242x10xf32> to vector<10x10xf32>
    %c30_72 = arith.constant 30 : index
    %c60_73 = arith.constant 60 : index
    %104 = vector.load %arg6[%c30_72, %c60_73] : memref<50x90xf32, #tpu.memory_space<vmem>>, vector<10x10xf32>
    tpu.vector_store %arg6[%c30_72, %c60_73], %103 {strides = array<i32>} : memref<50x90xf32, #tpu.memory_space<vmem>>, vector<10x10xf32>,
    %105 = vector.extract_strided_slice %36 {offsets = [60, 0], sizes = [10, 10], strides = [1, 1]} : vector<242x10xf32> to vector<10x10xf32>
    %c40_74 = arith.constant 40 : index
    %c60_75 = arith.constant 60 : index
    %106 = vector.load %arg6[%c40_74, %c60_75] : memref<50x90xf32, #tpu.memory_space<vmem>>, vector<10x10xf32>
    tpu.vector_store %arg6[%c40_74, %c60_75], %105 {strides = array<i32>} : memref<50x90xf32, #tpu.memory_space<vmem>>, vector<10x10xf32>,
    %107 = vector.extract_strided_slice %36 {offsets = [82, 0], sizes = [10, 10], strides = [1, 1]} : vector<242x10xf32> to vector<10x10xf32>
    %c0_76 = arith.constant 0 : index
    %c70 = arith.constant 70 : index
    %108 = vector.load %arg6[%c0_76, %c70] : memref<50x90xf32, #tpu.memory_space<vmem>>, vector<10x10xf32>
    tpu.vector_store %arg6[%c0_76, %c70], %107 {strides = array<i32>} : memref<50x90xf32, #tpu.memory_space<vmem>>, vector<10x10xf32>,
    %109 = vector.extract_strided_slice %36 {offsets = [92, 0], sizes = [10, 10], strides = [1, 1]} : vector<242x10xf32> to vector<10x10xf32>
    %c10_77 = arith.constant 10 : index
    %c70_78 = arith.constant 70 : index
    %110 = vector.load %arg6[%c10_77, %c70_78] : memref<50x90xf32, #tpu.memory_space<vmem>>, vector<10x10xf32>
    tpu.vector_store %arg6[%c10_77, %c70_78], %109 {strides = array<i32>} : memref<50x90xf32, #tpu.memory_space<vmem>>, vector<10x10xf32>,
    %111 = vector.extract_strided_slice %36 {offsets = [102, 0], sizes = [10, 10], strides = [1, 1]} : vector<242x10xf32> to vector<10x10xf32>
    %c20_79 = arith.constant 20 : index
    %c70_80 = arith.constant 70 : index
    %112 = vector.load %arg6[%c20_79, %c70_80] : memref<50x90xf32, #tpu.memory_space<vmem>>, vector<10x10xf32>
    tpu.vector_store %arg6[%c20_79, %c70_80], %111 {strides = array<i32>} : memref<50x90xf32, #tpu.memory_space<vmem>>, vector<10x10xf32>,
    %113 = vector.extract_strided_slice %36 {offsets = [112, 0], sizes = [10, 10], strides = [1, 1]} : vector<242x10xf32> to vector<10x10xf32>
    %c30_81 = arith.constant 30 : index
    %c70_82 = arith.constant 70 : index
    %114 = vector.load %arg6[%c30_81, %c70_82] : memref<50x90xf32, #tpu.memory_space<vmem>>, vector<10x10xf32>
    tpu.vector_store %arg6[%c30_81, %c70_82], %113 {strides = array<i32>} : memref<50x90xf32, #tpu.memory_space<vmem>>, vector<10x10xf32>,
    %115 = vector.extract_strided_slice %36 {offsets = [122, 0], sizes = [10, 10], strides = [1, 1]} : vector<242x10xf32> to vector<10x10xf32>
    %c40_83 = arith.constant 40 : index
    %c70_84 = arith.constant 70 : index
    %116 = vector.load %arg6[%c40_83, %c70_84] : memref<50x90xf32, #tpu.memory_space<vmem>>, vector<10x10xf32>
    tpu.vector_store %arg6[%c40_83, %c70_84], %115 {strides = array<i32>} : memref<50x90xf32, #tpu.memory_space<vmem>>, vector<10x10xf32>,
    %117 = vector.extract_strided_slice %36 {offsets = [14, 0], sizes = [10, 10], strides = [1, 1]} : vector<242x10xf32> to vector<10x10xf32>
    %c0_85 = arith.constant 0 : index
    %c80 = arith.constant 80 : index
    %118 = vector.load %arg6[%c0_85, %c80] : memref<50x90xf32, #tpu.memory_space<vmem>>, vector<10x10xf32>
    tpu.vector_store %arg6[%c0_85, %c80], %117 {strides = array<i32>} : memref<50x90xf32, #tpu.memory_space<vmem>>, vector<10x10xf32>,
    %119 = vector.extract_strided_slice %36 {offsets = [26, 0], sizes = [10, 10], strides = [1, 1]} : vector<242x10xf32> to vector<10x10xf32>
    %c10_86 = arith.constant 10 : index
    %c80_87 = arith.constant 80 : index
    %120 = vector.load %arg6[%c10_86, %c80_87] : memref<50x90xf32, #tpu.memory_space<vmem>>, vector<10x10xf32>
    tpu.vector_store %arg6[%c10_86, %c80_87], %119 {strides = array<i32>} : memref<50x90xf32, #tpu.memory_space<vmem>>, vector<10x10xf32>,
    %121 = vector.extract_strided_slice %36 {offsets = [38, 0], sizes = [10, 10], strides = [1, 1]} : vector<242x10xf32> to vector<10x10xf32>
    %c20_88 = arith.constant 20 : index
    %c80_89 = arith.constant 80 : index
    %122 = vector.load %arg6[%c20_88, %c80_89] : memref<50x90xf32, #tpu.memory_space<vmem>>, vector<10x10xf32>
    tpu.vector_store %arg6[%c20_88, %c80_89], %121 {strides = array<i32>} : memref<50x90xf32, #tpu.memory_space<vmem>>, vector<10x10xf32>,
    %123 = vector.extract_strided_slice %36 {offsets = [50, 0], sizes = [10, 10], strides = [1, 1]} : vector<242x10xf32> to vector<10x10xf32>
    %c30_90 = arith.constant 30 : index
    %c80_91 = arith.constant 80 : index
    %124 = vector.load %arg6[%c30_90, %c80_91] : memref<50x90xf32, #tpu.memory_space<vmem>>, vector<10x10xf32>
    tpu.vector_store %arg6[%c30_90, %c80_91], %123 {strides = array<i32>} : memref<50x90xf32, #tpu.memory_space<vmem>>, vector<10x10xf32>,
    %125 = vector.extract_strided_slice %36 {offsets = [62, 0], sizes = [10, 10], strides = [1, 1]} : vector<242x10xf32> to vector<10x10xf32>
    %c40_92 = arith.constant 40 : index
    %c80_93 = arith.constant 80 : index
    %126 = vector.load %arg6[%c40_92, %c80_93] : memref<50x90xf32, #tpu.memory_space<vmem>>, vector<10x10xf32>
    tpu.vector_store %arg6[%c40_92, %c80_93], %125 {strides = array<i32>} : memref<50x90xf32, #tpu.memory_space<vmem>>, vector<10x10xf32>,
    %c0_94 = arith.constant 0 : index
    %c0_95 = arith.constant 0 : index
    %127 = vector.load %arg6[%c0_94, %c0_95] : memref<50x90xf32, #tpu.memory_space<vmem>>, vector<50x90xf32>
    %c0_96 = arith.constant 0 : index
    %c0_97 = arith.constant 0 : index
    %128 = vector.load %arg2[%c0_96, %c0_97] : memref<90x10xf32, #tpu.memory_space<vmem>>, vector<90x10xf32>
    %cst_98 = arith.constant dense<0.000000e+00> : vector<50x10xf32>
    %129 = tpu.matmul %127, %128, %cst_98 {dimension_numbers = #tpu.dot_dimension_numbers<[1], [0], [0], [1], [0, 0, 1, 1], [], []>} : vector<50x90xf32>, vector<90x10xf32>, vector<50x10xf32> -> vector<50x10xf32>
    %130 = vector.broadcast %4 : vector<1x10xf32> to vector<50x10xf32>
    %131 = arith.addf %129, %130 : vector<50x10xf32>
    %cst_99 = arith.constant 0.000000e+00 : f32
    %132 = vector.broadcast %cst_99 : f32 to vector<50x10xf32>
    %133 = arith.cmpf oge, %131, %132 : vector<50x10xf32>
    %cst_100 = arith.constant 2.000000e-02 : f32
    %134 = vector.broadcast %cst_100 : f32 to vector<50x10xf32>
    %135 = arith.mulf %134, %131 : vector<50x10xf32>
    %136 = arith.select %133, %131, %135 : vector<50x10xi1>, vector<50x10xf32>
    %cst_101 = arith.constant dense<0.000000e+00> : vector<10xf32>
    %137 = vector.multi_reduction <add>, %136, %cst_101 [0] : vector<50x10xf32> to vector<10xf32>
    %138 = vector.shape_cast %137 : vector<10xf32> to vector<1x10xf32>
    %cst_102 = arith.constant 5.000000e+01 : f32
    %139 = vector.broadcast %cst_102 : f32 to vector<1x10xf32>
    %140 = arith.divf %138, %139 : vector<1x10xf32>
    %141 = vector.broadcast %140 : vector<1x10xf32> to vector<50x10xf32>
    %142 = arith.subf %136, %141 : vector<50x10xf32>
    %143 = arith.mulf %142, %142 : vector<50x10xf32>
    %cst_103 = arith.constant dense<0.000000e+00> : vector<10xf32>
    %144 = vector.multi_reduction <add>, %143, %cst_103 [0] : vector<50x10xf32> to vector<10xf32>
    %145 = vector.shape_cast %144 : vector<10xf32> to vector<1x10xf32>
    %cst_104 = arith.constant 5.000000e+01 : f32
    %146 = vector.broadcast %cst_104 : f32 to vector<1x10xf32>
    %147 = arith.divf %145, %146 : vector<1x10xf32>
    %cst_105 = arith.constant 9.99999974E-6 : f32
    %148 = vector.broadcast %cst_105 : f32 to vector<1x10xf32>
    %149 = arith.addf %147, %148 : vector<1x10xf32>
    %150 = math.rsqrt %149 : vector<1x10xf32>
    %151 = arith.mulf %150, %5 : vector<1x10xf32>
    %152 = vector.broadcast %151 : vector<1x10xf32> to vector<50x10xf32>
    %153 = arith.mulf %142, %152 : vector<50x10xf32>
    %154 = vector.broadcast %6 : vector<1x10xf32> to vector<50x10xf32>
    %155 = arith.addf %153, %154 : vector<50x10xf32>
    %cst_106 = arith.constant 0.000000e+00 : f32
    %156 = vector.broadcast %cst_106 : f32 to vector<2x400xf32>
    %c0_107 = arith.constant 0 : index
    %c0_108 = arith.constant 0 : index
    %157 = vector.load %arg7[%c0_107, %c0_108] : memref<2x400xf32, #tpu.memory_space<vmem>>, vector<2x400xf32>
    tpu.vector_store %arg7[%c0_107, %c0_108], %156 {strides = array<i32>} : memref<2x400xf32, #tpu.memory_space<vmem>>, vector<2x400xf32>,
    %158 = vector.extract_strided_slice %155 {offsets = [0, 0], sizes = [2, 10], strides = [1, 1]} : vector<50x10xf32> to vector<2x10xf32>
    %c0_109 = arith.constant 0 : index
    %c0_110 = arith.constant 0 : index
    %159 = vector.load %arg7[%c0_109, %c0_110] : memref<2x400xf32, #tpu.memory_space<vmem>>, vector<2x10xf32>
    tpu.vector_store %arg7[%c0_109, %c0_110], %158 {strides = array<i32>} : memref<2x400xf32, #tpu.memory_space<vmem>>, vector<2x10xf32>,
    %160 = vector.extract_strided_slice %155 {offsets = [2, 0], sizes = [2, 10], strides = [1, 1]} : vector<50x10xf32> to vector<2x10xf32>
    %c0_111 = arith.constant 0 : index
    %c16 = arith.constant 16 : index
    %161 = vector.load %arg7[%c0_111, %c16] : memref<2x400xf32, #tpu.memory_space<vmem>>, vector<2x10xf32>
    tpu.vector_store %arg7[%c0_111, %c16], %160 {strides = array<i32>} : memref<2x400xf32, #tpu.memory_space<vmem>>, vector<2x10xf32>,
    %162 = vector.extract_strided_slice %155 {offsets = [4, 0], sizes = [2, 10], strides = [1, 1]} : vector<50x10xf32> to vector<2x10xf32>
    %c0_112 = arith.constant 0 : index
    %c32 = arith.constant 32 : index
    %163 = vector.load %arg7[%c0_112, %c32] : memref<2x400xf32, #tpu.memory_space<vmem>>, vector<2x10xf32>
    tpu.vector_store %arg7[%c0_112, %c32], %162 {strides = array<i32>} : memref<2x400xf32, #tpu.memory_space<vmem>>, vector<2x10xf32>,
    %164 = vector.extract_strided_slice %155 {offsets = [6, 0], sizes = [2, 10], strides = [1, 1]} : vector<50x10xf32> to vector<2x10xf32>
    %c0_113 = arith.constant 0 : index
    %c48 = arith.constant 48 : index
    %165 = vector.load %arg7[%c0_113, %c48] : memref<2x400xf32, #tpu.memory_space<vmem>>, vector<2x10xf32>
    tpu.vector_store %arg7[%c0_113, %c48], %164 {strides = array<i32>} : memref<2x400xf32, #tpu.memory_space<vmem>>, vector<2x10xf32>,
    %166 = vector.extract_strided_slice %155 {offsets = [8, 0], sizes = [2, 10], strides = [1, 1]} : vector<50x10xf32> to vector<2x10xf32>
    %c0_114 = arith.constant 0 : index
    %c64 = arith.constant 64 : index
    %167 = vector.load %arg7[%c0_114, %c64] : memref<2x400xf32, #tpu.memory_space<vmem>>, vector<2x10xf32>
    tpu.vector_store %arg7[%c0_114, %c64], %166 {strides = array<i32>} : memref<2x400xf32, #tpu.memory_space<vmem>>, vector<2x10xf32>,
    %168 = vector.extract_strided_slice %155 {offsets = [10, 0], sizes = [2, 10], strides = [1, 1]} : vector<50x10xf32> to vector<2x10xf32>
    %c0_115 = arith.constant 0 : index
    %c80_116 = arith.constant 80 : index
    %169 = vector.load %arg7[%c0_115, %c80_116] : memref<2x400xf32, #tpu.memory_space<vmem>>, vector<2x10xf32>
    tpu.vector_store %arg7[%c0_115, %c80_116], %168 {strides = array<i32>} : memref<2x400xf32, #tpu.memory_space<vmem>>, vector<2x10xf32>,
    %170 = vector.extract_strided_slice %155 {offsets = [12, 0], sizes = [2, 10], strides = [1, 1]} : vector<50x10xf32> to vector<2x10xf32>
    %c0_117 = arith.constant 0 : index
    %c96 = arith.constant 96 : index
    %171 = vector.load %arg7[%c0_117, %c96] : memref<2x400xf32, #tpu.memory_space<vmem>>, vector<2x10xf32>
    tpu.vector_store %arg7[%c0_117, %c96], %170 {strides = array<i32>} : memref<2x400xf32, #tpu.memory_space<vmem>>, vector<2x10xf32>,
    %172 = vector.extract_strided_slice %155 {offsets = [14, 0], sizes = [2, 10], strides = [1, 1]} : vector<50x10xf32> to vector<2x10xf32>
    %c0_118 = arith.constant 0 : index
    %c112 = arith.constant 112 : index
    %173 = vector.load %arg7[%c0_118, %c112] : memref<2x400xf32, #tpu.memory_space<vmem>>, vector<2x10xf32>
    tpu.vector_store %arg7[%c0_118, %c112], %172 {strides = array<i32>} : memref<2x400xf32, #tpu.memory_space<vmem>>, vector<2x10xf32>,
    %174 = vector.extract_strided_slice %155 {offsets = [16, 0], sizes = [2, 10], strides = [1, 1]} : vector<50x10xf32> to vector<2x10xf32>
    %c0_119 = arith.constant 0 : index
    %c128 = arith.constant 128 : index
    %175 = vector.load %arg7[%c0_119, %c128] : memref<2x400xf32, #tpu.memory_space<vmem>>, vector<2x10xf32>
    tpu.vector_store %arg7[%c0_119, %c128], %174 {strides = array<i32>} : memref<2x400xf32, #tpu.memory_space<vmem>>, vector<2x10xf32>,
    %176 = vector.extract_strided_slice %155 {offsets = [18, 0], sizes = [2, 10], strides = [1, 1]} : vector<50x10xf32> to vector<2x10xf32>
    %c0_120 = arith.constant 0 : index
    %c144 = arith.constant 144 : index
    %177 = vector.load %arg7[%c0_120, %c144] : memref<2x400xf32, #tpu.memory_space<vmem>>, vector<2x10xf32>
    tpu.vector_store %arg7[%c0_120, %c144], %176 {strides = array<i32>} : memref<2x400xf32, #tpu.memory_space<vmem>>, vector<2x10xf32>,
    %178 = vector.extract_strided_slice %155 {offsets = [20, 0], sizes = [2, 10], strides = [1, 1]} : vector<50x10xf32> to vector<2x10xf32>
    %c0_121 = arith.constant 0 : index
    %c160 = arith.constant 160 : index
    %179 = vector.load %arg7[%c0_121, %c160] : memref<2x400xf32, #tpu.memory_space<vmem>>, vector<2x10xf32>
    tpu.vector_store %arg7[%c0_121, %c160], %178 {strides = array<i32>} : memref<2x400xf32, #tpu.memory_space<vmem>>, vector<2x10xf32>,
    %180 = vector.extract_strided_slice %155 {offsets = [22, 0], sizes = [2, 10], strides = [1, 1]} : vector<50x10xf32> to vector<2x10xf32>
    %c0_122 = arith.constant 0 : index
    %c176 = arith.constant 176 : index
    %181 = vector.load %arg7[%c0_122, %c176] : memref<2x400xf32, #tpu.memory_space<vmem>>, vector<2x10xf32>
    tpu.vector_store %arg7[%c0_122, %c176], %180 {strides = array<i32>} : memref<2x400xf32, #tpu.memory_space<vmem>>, vector<2x10xf32>,
    %182 = vector.extract_strided_slice %155 {offsets = [24, 0], sizes = [2, 10], strides = [1, 1]} : vector<50x10xf32> to vector<2x10xf32>
    %c0_123 = arith.constant 0 : index
    %c192 = arith.constant 192 : index
    %183 = vector.load %arg7[%c0_123, %c192] : memref<2x400xf32, #tpu.memory_space<vmem>>, vector<2x10xf32>
    tpu.vector_store %arg7[%c0_123, %c192], %182 {strides = array<i32>} : memref<2x400xf32, #tpu.memory_space<vmem>>, vector<2x10xf32>,
    %184 = vector.extract_strided_slice %155 {offsets = [26, 0], sizes = [2, 10], strides = [1, 1]} : vector<50x10xf32> to vector<2x10xf32>
    %c0_124 = arith.constant 0 : index
    %c208 = arith.constant 208 : index
    %185 = vector.load %arg7[%c0_124, %c208] : memref<2x400xf32, #tpu.memory_space<vmem>>, vector<2x10xf32>
    tpu.vector_store %arg7[%c0_124, %c208], %184 {strides = array<i32>} : memref<2x400xf32, #tpu.memory_space<vmem>>, vector<2x10xf32>,
    %186 = vector.extract_strided_slice %155 {offsets = [28, 0], sizes = [2, 10], strides = [1, 1]} : vector<50x10xf32> to vector<2x10xf32>
    %c0_125 = arith.constant 0 : index
    %c224 = arith.constant 224 : index
    %187 = vector.load %arg7[%c0_125, %c224] : memref<2x400xf32, #tpu.memory_space<vmem>>, vector<2x10xf32>
    tpu.vector_store %arg7[%c0_125, %c224], %186 {strides = array<i32>} : memref<2x400xf32, #tpu.memory_space<vmem>>, vector<2x10xf32>,
    %188 = vector.extract_strided_slice %155 {offsets = [30, 0], sizes = [2, 10], strides = [1, 1]} : vector<50x10xf32> to vector<2x10xf32>
    %c0_126 = arith.constant 0 : index
    %c240 = arith.constant 240 : index
    %189 = vector.load %arg7[%c0_126, %c240] : memref<2x400xf32, #tpu.memory_space<vmem>>, vector<2x10xf32>
    tpu.vector_store %arg7[%c0_126, %c240], %188 {strides = array<i32>} : memref<2x400xf32, #tpu.memory_space<vmem>>, vector<2x10xf32>,
    %190 = vector.extract_strided_slice %155 {offsets = [32, 0], sizes = [2, 10], strides = [1, 1]} : vector<50x10xf32> to vector<2x10xf32>
    %c0_127 = arith.constant 0 : index
    %c256 = arith.constant 256 : index
    %191 = vector.load %arg7[%c0_127, %c256] : memref<2x400xf32, #tpu.memory_space<vmem>>, vector<2x10xf32>
    tpu.vector_store %arg7[%c0_127, %c256], %190 {strides = array<i32>} : memref<2x400xf32, #tpu.memory_space<vmem>>, vector<2x10xf32>,
    %192 = vector.extract_strided_slice %155 {offsets = [34, 0], sizes = [2, 10], strides = [1, 1]} : vector<50x10xf32> to vector<2x10xf32>
    %c0_128 = arith.constant 0 : index
    %c272 = arith.constant 272 : index
    %193 = vector.load %arg7[%c0_128, %c272] : memref<2x400xf32, #tpu.memory_space<vmem>>, vector<2x10xf32>
    tpu.vector_store %arg7[%c0_128, %c272], %192 {strides = array<i32>} : memref<2x400xf32, #tpu.memory_space<vmem>>, vector<2x10xf32>,
    %194 = vector.extract_strided_slice %155 {offsets = [36, 0], sizes = [2, 10], strides = [1, 1]} : vector<50x10xf32> to vector<2x10xf32>
    %c0_129 = arith.constant 0 : index
    %c288 = arith.constant 288 : index
    %195 = vector.load %arg7[%c0_129, %c288] : memref<2x400xf32, #tpu.memory_space<vmem>>, vector<2x10xf32>
    tpu.vector_store %arg7[%c0_129, %c288], %194 {strides = array<i32>} : memref<2x400xf32, #tpu.memory_space<vmem>>, vector<2x10xf32>,
    %196 = vector.extract_strided_slice %155 {offsets = [38, 0], sizes = [2, 10], strides = [1, 1]} : vector<50x10xf32> to vector<2x10xf32>
    %c0_130 = arith.constant 0 : index
    %c304 = arith.constant 304 : index
    %197 = vector.load %arg7[%c0_130, %c304] : memref<2x400xf32, #tpu.memory_space<vmem>>, vector<2x10xf32>
    tpu.vector_store %arg7[%c0_130, %c304], %196 {strides = array<i32>} : memref<2x400xf32, #tpu.memory_space<vmem>>, vector<2x10xf32>,
    %198 = vector.extract_strided_slice %155 {offsets = [40, 0], sizes = [2, 10], strides = [1, 1]} : vector<50x10xf32> to vector<2x10xf32>
    %c0_131 = arith.constant 0 : index
    %c320 = arith.constant 320 : index
    %199 = vector.load %arg7[%c0_131, %c320] : memref<2x400xf32, #tpu.memory_space<vmem>>, vector<2x10xf32>
    tpu.vector_store %arg7[%c0_131, %c320], %198 {strides = array<i32>} : memref<2x400xf32, #tpu.memory_space<vmem>>, vector<2x10xf32>,
    %200 = vector.extract_strided_slice %155 {offsets = [42, 0], sizes = [2, 10], strides = [1, 1]} : vector<50x10xf32> to vector<2x10xf32>
    %c0_132 = arith.constant 0 : index
    %c336 = arith.constant 336 : index
    %201 = vector.load %arg7[%c0_132, %c336] : memref<2x400xf32, #tpu.memory_space<vmem>>, vector<2x10xf32>
    tpu.vector_store %arg7[%c0_132, %c336], %200 {strides = array<i32>} : memref<2x400xf32, #tpu.memory_space<vmem>>, vector<2x10xf32>,
    %202 = vector.extract_strided_slice %155 {offsets = [44, 0], sizes = [2, 10], strides = [1, 1]} : vector<50x10xf32> to vector<2x10xf32>
    %c0_133 = arith.constant 0 : index
    %c352 = arith.constant 352 : index
    %203 = vector.load %arg7[%c0_133, %c352] : memref<2x400xf32, #tpu.memory_space<vmem>>, vector<2x10xf32>
    tpu.vector_store %arg7[%c0_133, %c352], %202 {strides = array<i32>} : memref<2x400xf32, #tpu.memory_space<vmem>>, vector<2x10xf32>,
    %204 = vector.extract_strided_slice %155 {offsets = [46, 0], sizes = [2, 10], strides = [1, 1]} : vector<50x10xf32> to vector<2x10xf32>
    %c0_134 = arith.constant 0 : index
    %c368 = arith.constant 368 : index
    %205 = vector.load %arg7[%c0_134, %c368] : memref<2x400xf32, #tpu.memory_space<vmem>>, vector<2x10xf32>
    tpu.vector_store %arg7[%c0_134, %c368], %204 {strides = array<i32>} : memref<2x400xf32, #tpu.memory_space<vmem>>, vector<2x10xf32>,
    %206 = vector.extract_strided_slice %155 {offsets = [48, 0], sizes = [2, 10], strides = [1, 1]} : vector<50x10xf32> to vector<2x10xf32>
    %c0_135 = arith.constant 0 : index
    %c384 = arith.constant 384 : index
    %207 = vector.load %arg7[%c0_135, %c384] : memref<2x400xf32, #tpu.memory_space<vmem>>, vector<2x10xf32>
    tpu.vector_store %arg7[%c0_135, %c384], %206 {strides = array<i32>} : memref<2x400xf32, #tpu.memory_space<vmem>>, vector<2x10xf32>,
    %c0_136 = arith.constant 0 : index
    %c0_137 = arith.constant 0 : index
    %208 = vector.load %arg7[%c0_136, %c0_137] : memref<2x400xf32, #tpu.memory_space<vmem>>, vector<2x400xf32>
    %c0_138 = arith.constant 0 : index
    %c0_139 = arith.constant 0 : index
    %209 = vector.load %arg3[%c0_138, %c0_139] : memref<400x10xf32, #tpu.memory_space<vmem>>, vector<400x10xf32>
    %cst_140 = arith.constant dense<0.000000e+00> : vector<2x10xf32>
    %210 = tpu.matmul %208, %209, %cst_140 {dimension_numbers = #tpu.dot_dimension_numbers<[1], [0], [0], [1], [0, 0, 1, 1], [], []>} : vector<2x400xf32>, vector<400x10xf32>, vector<2x10xf32> -> vector<2x10xf32>
    %211 = vector.broadcast %7 : vector<1x10xf32> to vector<2x10xf32>
    %212 = arith.addf %210, %211 : vector<2x10xf32>
    %cst_141 = arith.constant 5.000000e-01 : f32
    %213 = vector.broadcast %cst_141 : f32 to vector<2x10xf32>
    %214 = arith.mulf %213, %212 : vector<2x10xf32>
    %215 = math.tanh %214 : vector<2x10xf32>
    %cst_142 = arith.constant 5.000000e-01 : f32
    %216 = vector.broadcast %cst_142 : f32 to vector<2x10xf32>
    %217 = arith.mulf %216, %215 : vector<2x10xf32>
    %cst_143 = arith.constant 5.000000e-01 : f32
    %218 = vector.broadcast %cst_143 : f32 to vector<2x10xf32>
    %219 = arith.addf %217, %218 : vector<2x10xf32>
    %c0_144 = arith.constant 0 : index
    %c0_145 = arith.constant 0 : index
    %220 = vector.load %arg5[%c0_144, %c0_145] : memref<2x10xf32, #tpu.memory_space<vmem>>, vector<2x10xf32>
    tpu.vector_store %arg5[%c0_144, %c0_145], %219 {strides = array<i32>} : memref<2x10xf32, #tpu.memory_space<vmem>>, vector<2x10xf32>,
    return
  }
}

</mosaic_0001>

<bundles_post_ra>
// kernel: classifier_forward.1
= control target key start
LH: loop header
LB: loop body
LE: loop exit
PB: predicated region body
PF: predicated region fallthrough
CT: control target
= control target key end

     0   :  { %vm153_vm0 = vcmask 1040384   ;;  %v2111_v1 = vmov 0.0   ;;  %vm2112_vm1 = vmmov 0   ;;  %vm59_vm2 = vcmask 72704   ;;  %s3396_s0 = inlined_call_operand.vmem [shape: f32[242,9], index: 0, kind: input, shape index: {}]   ;;  %s3397_s1 = inlined_call_operand.vmem [shape: f32[9,10], index: 1, kind: input, shape index: {}]   ;;  %s3398_s2 = inlined_call_operand.vmem [shape: f32[90,10], index: 2, kind: input, shape index: {}]   ;;  %s3399_s3 = inlined_call_operand.vmem [shape: f32[400,10], index: 3, kind: input, shape index: {}]   ;;  %s3400_s4 = inlined_call_operand.vmem [shape: f32[7,10], index: 4, kind: input, shape index: {}]   ;;  %s3401_s5 = inlined_call_operand.hbm [shape: f32[2,10], index: 5, kind: output, shape index: {}]  }
   0x1   :  { %v54_v0 = vld [vmem:[%s3397_s1 + $0x8] sm:$0x1]  ;;  %1917 = vmatprep.subr.mxu0 %v2111_v1  ;;  %v53_v2 = vld [vmem:[%s3397_s1] sm:$0xff]  ;;  %1921 = vmatprep.mubr.msk.f32.mxu0 %vm2112_vm1, %v2111_v1  ;;  %v24_v6 = vld [vmem:[%s3396_s0 + $0x10] sm:$0xff] }
   0x2   :  { %1918 = vmatpush3.msk.msra.mxu0 %vm153_vm0, %v54_v0  ;;  %v22_v3 = vld [vmem:[%s3396_s0] sm:$0xff]  ;;  %2059 = vmatprep.subr.mxu1 %v2111_v1  ;;  %v23_v4 = vld [vmem:[%s3396_s0 + $0x8] sm:$0xff]  ;;  %v48_v7 = vld [vmem:[%s3396_s0 + $0xd0] sm:$0xff] }
   0x3   :  { %1919 = vmatprep.subr.mxu0 %v2111_v1  ;;  %2061 = vmatpush3.msk.msra.mxu1 %vm153_vm0, %v54_v0  ;;  %v47_v5 = vld [vmem:[%s3396_s0 + $0xc8] sm:$0xff] }
   0x4   :  { %1920 = vmatpush3.msra.mxu0 %v53_v2  ;;  %2060 = vmatprep.subr.mxu1 %v2111_v1 }
   0x5   :  { %1922 = vmatmul.mubr.msk.f32.vlgmr.msra.gmra.mxu0 %vm59_vm2, %v22_v3  ;;  %2062 = vmatpush3.msra.mxu1 %v53_v2 }
   0x6   :  { %1924 = vmatprep.mubr.msk.f32.mxu0 %vm2112_vm1, %v2111_v1  ;;  %1996 = vmatprep.mubr.msk.f32.mxu1 %vm2112_vm1, %v2111_v1 }
   0x7   :  { %2014 = vmatprep.subr.mxu1 %v2111_v1  ;;  %1997 = vmatmul.mubr.msk.f32.vlgmr.msra.gmra.mxu1 %vm59_vm2, %v47_v5 }
   0x8   :  { %1999 = vmatprep.mubr.msk.f32.mxu1 %vm2112_vm1, %v2111_v1 }
   0x9   :  { %1925 = vmatmul.mubr.msk.f32.gmra.mxu0 %vm59_vm2, %v23_v4 }
   0xa   :  { %1927 = vmatprep.mubr.msk.f32.mxu0 %vm2112_vm1, %v2111_v1 }
   0xb   :  { %10 = vsyncpa [#allocation5], 0  ;;  %2000 = vmatmul.mubr.msk.f32.gmra.mxu1 %vm59_vm2, %v48_v7  ;;  %v25_v8 = vld [vmem:[%s3396_s0 + $0x18] sm:$0xff]  ;;  %v26_v10 = vld [vmem:[%s3396_s0 + $0x20] sm:$0xff]  ;;  %v55_v61 = vlaneseq  ;;  %vm3403_vm6 = vcmask 80896   ;;  %s2113_s7 = smov 10  }
   0xc   :  { %2002 = vmatprep.mubr.msk.f32.mxu1 %vm2112_vm1, %v2111_v1  ;;  %v49_v9 = vld [vmem:[%s3396_s0 + $0xd8] sm:$0xff]  ;;  %v50_v11 = vld [vmem:[%s3396_s0 + $0xe0] sm:$0xff]  ;;  %v27_v12 = vld [vmem:[%s3396_s0 + $0x28] sm:$0xff]  ;;  %s2114_s8 = smov 20   ;;  %s2115_s9 = smov 30  }
   0xd   :  { %1928 = vmatmul.mubr.msk.f32.gmra.mxu0 %vm59_vm2, %v24_v6  ;;  %v51_v13 = vld [vmem:[%s3396_s0 + $0xe8] sm:$0xff]  ;;  %v28_v14 = vld [vmem:[%s3396_s0 + $0x30] sm:$0xff]  ;;  %v29_v16 = vld [vmem:[%s3396_s0 + $0x38] sm:$0xff]  ;;  %v2370_v0 = vshrl.u32 %v55_v61, 7  ;;  %s2116_s12 = smov 40   ;;  %s2117_s15 = smov 50  }
   0xe   :  { %1930 = vmatprep.mubr.msk.f32.mxu0 %vm2112_vm1, %v2111_v1  ;;  %v52_v15 = vld [vmem:[%s3396_s0 + $0xf0] sm:$0x3]  ;;  %v30_v17 = vld [vmem:[%s3396_s0 + $0x40] sm:$0xff]  ;;  %v31_v18 = vld [vmem:[%s3396_s0 + $0x48] sm:$0xff]  ;;  %s2118_s22 = smov 60   ;;  %s2119_s28 = smov 70  }
   0xf   :  { %2003 = vmatmul.mubr.msk.f32.gmra.mxu1 %vm59_vm2, %v49_v9  ;;  %v32_v19 = vld [vmem:[%s3396_s0 + $0x50] sm:$0xff]  ;;  %v33_v20 = vld [vmem:[%s3396_s0 + $0x58] sm:$0xff]  ;;  %v34_v21 = vld [vmem:[%s3396_s0 + $0x60] sm:$0xff]  ;;  %v57_v4 = vsub.s32 0, %v2370_v0  ;;  %s2120_s10 = smov 80   ;;  %s2124_s25 = smov 32  }
  0x10   :  { %2005 = vmatprep.mubr.msk.f32.mxu1 %vm2112_vm1, %v2111_v1  ;;  %v35_v22 = vld [vmem:[%s3396_s0 + $0x68] sm:$0xff]  ;;  %v36_v23 = vld [vmem:[%s3396_s0 + $0x70] sm:$0xff]  ;;  %v37_v24 = vld [vmem:[%s3396_s0 + $0x78] sm:$0xff]  ;;  %s2126_s23 = smov 48   ;;  %s2127_s14 = smov 112  }
  0x11   :  { %1931 = vmatmul.mubr.msk.f32.gmra.mxu0 %vm59_vm2, %v25_v8  ;;  %v38_v25 = vld [vmem:[%s3396_s0 + $0x80] sm:$0xff]  ;;  %v39_v26 = vld [vmem:[%s3396_s0 + $0x88] sm:$0xff]  ;;  %v40_v27 = vld [vmem:[%s3396_s0 + $0x90] sm:$0xff] }
  0x12   :  { %1933 = vmatprep.mubr.msk.f32.mxu0 %vm2112_vm1, %v2111_v1  ;;  %v41_v28 = vld [vmem:[%s3396_s0 + $0x98] sm:$0xff]  ;;  %v42_v29 = vld [vmem:[%s3396_s0 + $0xa0] sm:$0xff]  ;;  %v43_v30 = vld [vmem:[%s3396_s0 + $0xa8] sm:$0xff] }
  0x13   :  { %2006 = vmatmul.mubr.msk.f32.gmra.mxu1 %vm59_vm2, %v50_v11  ;;  %v44_v31 = vld [vmem:[%s3396_s0 + $0xb0] sm:$0xff]  ;;  %v45_v32 = vld [vmem:[%s3396_s0 + $0xb8] sm:$0xff]  ;;  %v46_v33 = vld [vmem:[%s3396_s0 + $0xc0] sm:$0xff] }
  0x14   :  { %2008 = vmatprep.mubr.msk.f32.mxu1 %vm2112_vm1, %v2111_v1  ;;  %v2376_v5 = vld [vmem:[%s3400_s4] sm:$0x7f] }
  0x15   :  { %1934 = vmatmul.mubr.msk.f32.gmra.mxu0 %vm59_vm2, %v26_v10  ;;  %v2379_v8 = vrot.slane %v2376_v5, %v57_v4 }
  0x16   :  { %1936 = vmatprep.mubr.msk.f32.mxu0 %vm2112_vm1, %v2111_v1 }
  0x17   :  { %2009 = vmatmul.mubr.msk.f32.gmra.mxu1 %vm59_vm2, %v51_v13 }
  0x18   :  { %2011 = vmatprep.mubr.msk.f32.mxu1 %vm2112_vm1, %v2111_v1 }
  0x19   :  { %1937 = vmatmul.mubr.msk.f32.gmra.mxu0 %vm59_vm2, %v27_v12 }
  0x1a   :  { %1939 = vmatprep.mubr.msk.f32.mxu0 %vm2112_vm1, %v2111_v1 }
  0x1b   :  { %2012 = vmatmul.mubr.msk.f32.gmra.mxu1 %vm59_vm2, %v52_v15 }
  0x1c   :  { %2038 = vmatprep.mubr.msk.f32.mxu1 %vm2112_vm1, %v2111_v1 }
  0x1d   :  { %1940 = vmatmul.mubr.msk.f32.gmra.mxu0 %vm59_vm2, %v28_v14 }
  0x1e   :  { %1942 = vmatprep.mubr.msk.f32.mxu0 %vm2112_vm1, %v2111_v1 }
  0x21   :  { %1943 = vmatmul.mubr.msk.f32.gmra.mxu0 %vm59_vm2, %v29_v16 }
  0x22   :  { %1945 = vmatprep.mubr.msk.f32.mxu0 %vm2112_vm1, %v2111_v1 }
  0x25   :  { %1946 = vmatmul.mubr.msk.f32.gmra.mxu0 %vm59_vm2, %v30_v17 }
  0x26   :  { %1948 = vmatprep.mubr.msk.f32.mxu0 %vm2112_vm1, %v2111_v1 }
  0x29   :  { %1949 = vmatmul.mubr.msk.f32.gmra.mxu0 %vm59_vm2, %v31_v18 }
  0x2a   :  { %1951 = vmatprep.mubr.msk.f32.mxu0 %vm2112_vm1, %v2111_v1 }
  0x2d   :  { %1952 = vmatmul.mubr.msk.f32.gmra.mxu0 %vm59_vm2, %v32_v19 }
  0x2e   :  { %1954 = vmatprep.mubr.msk.f32.mxu0 %vm2112_vm1, %v2111_v1 }
  0x31   :  { %1955 = vmatmul.mubr.msk.f32.gmra.mxu0 %vm59_vm2, %v33_v20 }
  0x32   :  { %1957 = vmatprep.mubr.msk.f32.mxu0 %vm2112_vm1, %v2111_v1 }
  0x35   :  { %1958 = vmatmul.mubr.msk.f32.gmra.mxu0 %vm59_vm2, %v34_v21 }
  0x36   :  { %1960 = vmatprep.mubr.msk.f32.mxu0 %vm2112_vm1, %v2111_v1 }
  0x39   :  { %1961 = vmatmul.mubr.msk.f32.gmra.mxu0 %vm59_vm2, %v35_v22 }
  0x3a   :  { %1963 = vmatprep.mubr.msk.f32.mxu0 %vm2112_vm1, %v2111_v1 }
  0x3d   :  { %1964 = vmatmul.mubr.msk.f32.gmra.mxu0 %vm59_vm2, %v36_v23 }
  0x3e   :  { %1966 = vmatprep.mubr.msk.f32.mxu0 %vm2112_vm1, %v2111_v1 }
  0x41   :  { %1967 = vmatmul.mubr.msk.f32.gmra.mxu0 %vm59_vm2, %v37_v24 }
  0x42   :  { %1969 = vmatprep.mubr.msk.f32.mxu0 %vm2112_vm1, %v2111_v1 }
  0x45   :  { %1970 = vmatmul.mubr.msk.f32.gmra.mxu0 %vm59_vm2, %v38_v25 }
  0x46   :  { %1972 = vmatprep.mubr.msk.f32.mxu0 %vm2112_vm1, %v2111_v1 }
  0x49   :  { %1973 = vmatmul.mubr.msk.f32.gmra.mxu0 %vm59_vm2, %v39_v26 }
  0x4a   :  { %1975 = vmatprep.mubr.msk.f32.mxu0 %vm2112_vm1, %v2111_v1 }
  0x4d   :  { %1976 = vmatmul.mubr.msk.f32.gmra.mxu0 %vm59_vm2, %v40_v27 }
  0x4e   :  { %1978 = vmatprep.mubr.msk.f32.mxu0 %vm2112_vm1, %v2111_v1 }
  0x51   :  { %1979 = vmatmul.mubr.msk.f32.gmra.mxu0 %vm59_vm2, %v41_v28 }
  0x52   :  { %1981 = vmatprep.mubr.msk.f32.mxu0 %vm2112_vm1, %v2111_v1 }
  0x55   :  { %1982 = vmatmul.mubr.msk.f32.gmra.mxu0 %vm59_vm2, %v42_v29 }
  0x56   :  { %1984 = vmatprep.mubr.msk.f32.mxu0 %vm2112_vm1, %v2111_v1 }
  0x59   :  { %1985 = vmatmul.mubr.msk.f32.gmra.mxu0 %vm59_vm2, %v43_v30 }
  0x5a   :  { %1987 = vmatprep.mubr.msk.f32.mxu0 %vm2112_vm1, %v2111_v1 }
  0x5d   :  { %1988 = vmatmul.mubr.msk.f32.gmra.mxu0 %vm59_vm2, %v44_v31 }
  0x5e   :  { %1990 = vmatprep.mubr.msk.f32.mxu0 %vm2112_vm1, %v2111_v1 }
  0x61   :  { %1991 = vmatmul.mubr.msk.f32.gmra.mxu0 %vm59_vm2, %v45_v32 }
  0x62   :  { %1993 = vmatprep.mubr.msk.f32.mxu0 %vm2112_vm1, %v2111_v1 }
  0x65   :  { %1994 = vmatmul.mubr.msk.f32.gmra.mxu0 %vm59_vm2, %v46_v33 }
  0xc5   :  { %v223_v34 = vpop.f32.mrf.mxu0 }
  0xc6   :  { %v224_v12 = vadd.f32 %v223_v34, %v2379_v8 }
  0xc7   :  { %v1923_v35 = vpop.f32.mrf.mxu0  ;;  %v2358_v37 = vpop.f32.mrf.mxu1 }
  0xc8   :  { %v408_v18 = vmul.f32 0.02, %v224_v12  ;;  %vm377_vm4 = vcmp.ge.f32.partialorder %v224_v12, 0.0 }
  0xc9   :  { %v228_v36 = vpop.f32.mrf.mxu0  ;;  %v1998_v39 = vpop.f32.mrf.mxu1 }
  0xca   :  { %v229_v10 = vadd.f32 %v228_v36, %v2379_v8  ;;  %v2389_v26 = vsel %vm377_vm4, %v224_v12, %v408_v18 }
  0xcb   :  { %v1926_v38 = vpop.f32.mrf.mxu0  ;;  %v2360_v41 = vpop.f32.mrf.mxu1  ;;  %v471_v35 = vsel %vm3403_vm6, %v2389_v26, 0.0 }
  0xcc   :  { %v409_v15 = vmul.f32 0.02, %v229_v10  ;;  %vm378_vm3 = vcmp.ge.f32.partialorder %v229_v10, 0.0 }
  0xcd   :  { %v233_v40 = vpop.f32.mrf.mxu0  ;;  %v2001_v43 = vpop.f32.mrf.mxu1 }
  0xce   :  { %v234_v13 = vadd.f32 %v233_v40, %v2379_v8  ;;  %v2386_v22 = vsel %vm378_vm3, %v229_v10, %v409_v15 }
  0xcf   :  { %v1929_v42 = vpop.f32.mrf.mxu0  ;;  %v2362_v45 = vpop.f32.mrf.mxu1  ;;  %v472_v30 = vsel %vm3403_vm6, %v2386_v22, 0.0 }
  0xd0   :  { %v410_v19 = vmul.f32 0.02, %v234_v13  ;;  %vm379_vm5 = vcmp.ge.f32.partialorder %v234_v13, 0.0  ;;  %v473_v39 = vadd.f32 %v472_v30, %v471_v35 }
  0xd1   :  { %v238_v44 = vpop.f32.mrf.mxu0  ;;  %v2004_v47 = vpop.f32.mrf.mxu1 }
  0xd2   :  { %v239_v16 = vadd.f32 %v238_v44, %v2379_v8  ;;  %v2391_v27 = vsel %vm379_vm5, %v234_v13, %v410_v19 }
  0xd3   :  { %v1932_v46 = vpop.f32.mrf.mxu0  ;;  %v2364_v49 = vpop.f32.mrf.mxu1  ;;  %v474_v36 = vsel %vm3403_vm6, %v2391_v27, 0.0 }
  0xd4   :  { %v411_v23 = vmul.f32 0.02, %v239_v16  ;;  %vm380_vm7 = vcmp.ge.f32.partialorder %v239_v16, 0.0  ;;  %v475_v47 = vadd.f32 %v474_v36, %v473_v39 }
  0xd5   :  { %v243_v48 = vpop.f32.mrf.mxu0  ;;  %v2007_v51 = vpop.f32.mrf.mxu1 }
  0xd6   :  { %v244_v20 = vadd.f32 %v243_v48, %v2379_v8  ;;  %v2396_v32 = vsel %vm380_vm7, %v239_v16, %v411_v23 }
  0xd7   :  { %v1935_v50 = vpop.f32.mrf.mxu0  ;;  %v2366_v53 = vpop.f32.mrf.mxu1  ;;  %v476_v44 = vsel %vm3403_vm6, %v2396_v32, 0.0 }
  0xd8   :  { %v412_v28 = vmul.f32 0.02, %v244_v20  ;;  %vm381_vm8 = vcmp.ge.f32.partialorder %v244_v20, 0.0 }
  0xd9   :  { %v248_v52 = vpop.f32.mrf.mxu0  ;;  %v2010_v55 = vpop.f32.mrf.mxu1 }
  0xda   :  { %v249_v24 = vadd.f32 %v248_v52, %v2379_v8  ;;  %v2403_v40 = vsel %vm381_vm8, %v244_v20, %v412_v28  ;;  %v477_v55 = vadd.f32 %v476_v44, %v475_v47 }
  0xdb   :  { %v1938_v54 = vpop.f32.mrf.mxu0  ;;  %v2368_v57 = vpop.f32.mrf.mxu1  ;;  %v478_v52 = vsel %vm3403_vm6, %v2403_v40, 0.0 }
  0xdc   :  { %v413_v33 = vmul.f32 0.02, %v249_v24  ;;  %vm382_vm9 = vcmp.ge.f32.partialorder %v249_v24, 0.0 }
  0xdd   :  { %v253_v56 = vpop.f32.mrf.mxu0  ;;  %v2013_v59 = vpop.f32.mrf.mxu1 }
  0xde   :  { %v254_v29 = vadd.f32 %v253_v56, %v2379_v8  ;;  %v2408_v48 = vsel %vm382_vm9, %v249_v24, %v413_v33 }
  0xdf   :  { %v1941_v58 = vpop.f32.mrf.mxu0 }
  0xe0   :  { %v414_v42 = vmul.f32 0.02, %v254_v29  ;;  %vm383_vm10 = vcmp.ge.f32.partialorder %v254_v29, 0.0 }
  0xe1   :  { %v258_v60 = vpop.f32.mrf.mxu0 }
  0xe2   :  { %v259_v34 = vadd.f32 %v258_v60, %v2379_v8  ;;  %v2413_v56 = vsel %vm383_vm10, %v254_v29, %v414_v42  ;;  %v480_v60 = vsel %vm3403_vm6, %v2408_v48, 0.0 }
  0xe3   :  { %v1944_v62 = vpop.f32.mrf.mxu0  ;;  %v482_v4 = vsel %vm3403_vm6, %v2413_v56, 0.0 }
  0xe4   :  { %v415_v50 = vmul.f32 0.02, %v259_v34  ;;  %vm384_vm11 = vcmp.ge.f32.partialorder %v259_v34, 0.0  ;;  %v479_v62 = vadd.f32 %v478_v52, %v477_v55 }
  0xe5   :  { %v263_v63 = vpop.f32.mrf.mxu0 }
  0xe6   :  { %v264_v43 = vadd.f32 %v263_v63, %v2379_v8  ;;  %v2418_v63 = vsel %vm384_vm11, %v259_v34, %v415_v50 }
  0xe7   :  { %v1947_v2 = vpop.f32.mrf.mxu0  ;;  %v484_v13 = vsel %vm3403_vm6, %v2418_v63, 0.0 }
  0xe8   :  { %v416_v58 = vmul.f32 0.02, %v264_v43  ;;  %vm385_vm12 = vcmp.ge.f32.partialorder %v264_v43, 0.0 }
  0xe9   :  { %v268_v3 = vpop.f32.mrf.mxu0 }
  0xea   :  { %v269_v51 = vadd.f32 %v268_v3, %v2379_v8  ;;  %v2423_v10 = vsel %vm385_vm12, %v264_v43, %v416_v58 }
  0xeb   :  { %v1950_v6 = vpop.f32.mrf.mxu0  ;;  %v486_v19 = vsel %vm3403_vm6, %v2423_v10, 0.0 }
  0xec   :  { %v417_v2 = vmul.f32 0.02, %v269_v51  ;;  %vm386_vm13 = vcmp.ge.f32.partialorder %v269_v51, 0.0 }
  0xed   :  { %v273_v7 = vpop.f32.mrf.mxu0 }
  0xee   :  { %v274_v59 = vadd.f32 %v273_v7, %v2379_v8  ;;  %v2428_v16 = vsel %vm386_vm13, %v269_v51, %v417_v2 }
  0xef   :  { %v1953_v9 = vpop.f32.mrf.mxu0  ;;  %v488_v28 = vsel %vm3403_vm6, %v2428_v16, 0.0 }
  0xf0   :  { %v481_v9 = vadd.f32 %v480_v60, %v479_v62  ;;  %v418_v7 = vmul.f32 0.02, %v274_v59  ;;  %vm387_vm14 = vcmp.ge.f32.partialorder %v274_v59, 0.0 }
  0xf1   :  { %v278_v11 = vpop.f32.mrf.mxu0 }
  0xf2   :  { %v279_v3 = vadd.f32 %v278_v11, %v2379_v8  ;;  %v483_v15 = vadd.f32 %v482_v4, %v481_v9  ;;  %v2433_v23 = vsel %vm387_vm14, %v274_v59, %v418_v7 }
  0xf3   :  { %v1956_v14 = vpop.f32.mrf.mxu0  ;;  %v490_v34 = vsel %vm3403_vm6, %v2433_v23, 0.0 }
  0xf4   :  { %v419_v11 = vmul.f32 0.02, %v279_v3  ;;  %vm388_vm15 = vcmp.ge.f32.partialorder %v279_v3, 0.0 }
  0xf5   :  { %v283_v17 = vpop.f32.mrf.mxu0 }
  0xf6   :  { %v284_v12 = vadd.f32 %v283_v17, %v2379_v8 }
  0xf7   :  { %v1959_v21 = vpop.f32.mrf.mxu0 }
  0xf8   :  { %v485_v21 = vadd.f32 %v484_v13, %v483_v15  ;;  %v420_v17 = vmul.f32 0.02, %v284_v12  ;;  %vm389_vm0 = vcmp.ge.f32.partialorder %v284_v12, 0.0 }
  0xf9   :  { %v288_v25 = vpop.f32.mrf.mxu0 }
  0xfa   :  { %v289_v18 = vadd.f32 %v288_v25, %v2379_v8  ;;  %v487_v30 = vadd.f32 %v486_v19, %v485_v21  ;;  %v2443_v39 = vsel %vm389_vm0, %v284_v12, %v420_v17 }
  0xfb   :  { %v1962_v31 = vpop.f32.mrf.mxu0  ;;  %v494_v52 = vsel %vm3403_vm6, %v2443_v39, 0.0 }
  0xfc   :  { %v2438_v31 = vsel %vm388_vm15, %v279_v3, %v419_v11  ;;  %v421_v25 = vmul.f32 0.02, %v289_v18  ;;  %vm390_vm2 = vcmp.ge.f32.partialorder %v289_v18, 0.0  ;;  %v489_v36 = vadd.f32 %v488_v28, %v487_v30 }
  0xfd   :  { %v293_v38 = vpop.f32.mrf.mxu0  ;;  %v492_v43 = vsel %vm3403_vm6, %v2438_v31, 0.0 }
  0xfe   :  { %v294_v24 = vadd.f32 %v293_v38, %v2379_v8  ;;  %v2448_v47 = vsel %vm390_vm2, %v289_v18, %v421_v25 }
  0xff   :  { %v1965_v46 = vpop.f32.mrf.mxu0 }
 0x100   :  { %v422_v38 = vmul.f32 0.02, %v294_v24  ;;  %vm391_vm3 = vcmp.ge.f32.partialorder %v294_v24, 0.0  ;;  %v491_v46 = vadd.f32 %v490_v34, %v489_v36 }
 0x101   :  { %v298_v54 = vpop.f32.mrf.mxu0 }
 0x102   :  { %v299_v33 = vadd.f32 %v298_v54, %v2379_v8  ;;  %v493_v55 = vadd.f32 %v492_v43, %v491_v46  ;;  %v2453_v58 = vsel %vm391_vm3, %v294_v24, %v422_v38 }
 0x103   :  { %v1968_v61 = vpop.f32.mrf.mxu0  ;;  %v498_v9 = vsel %vm3403_vm6, %v2453_v58, 0.0 }
 0x104   :  { %v423_v50 = vmul.f32 0.02, %v299_v33  ;;  %vm392_vm4 = vcmp.ge.f32.partialorder %v299_v33, 0.0  ;;  %v496_v61 = vsel %vm3403_vm6, %v2448_v47, 0.0  ;;  %v495_v2 = vadd.f32 %v494_v52, %v493_v55 }
 0x105   :  { %v303_v6 = vpop.f32.mrf.mxu0 }
 0x106   :  { %v304_v42 = vadd.f32 %v303_v6, %v2379_v8  ;;  %v2458_v3 = vsel %vm392_vm4, %v299_v33, %v423_v50  ;;  %v497_v12 = vadd.f32 %v496_v61, %v495_v2  ;;  %v349_v61 = vadd.f32 %v2358_v37, %v2379_v8 }
 0x107   :  { %v1971_v14 = vpop.f32.mrf.mxu0  ;;  %v500_v11 = vsel %vm3403_vm6, %v2458_v3, 0.0 }
 0x108   :  { %v424_v59 = vmul.f32 0.02, %v304_v42  ;;  %vm393_vm5 = vcmp.ge.f32.partialorder %v304_v42, 0.0  ;;  %v499_v19 = vadd.f32 %v498_v9, %v497_v12  ;;  %vm402_vm14 = vcmp.ge.f32.partialorder %v349_v61, 0.0 }
 0x109   :  { %v308_v20 = vpop.f32.mrf.mxu0 }
 0x10a   :  { %v309_v51 = vadd.f32 %v308_v20, %v2379_v8  ;;  %v2463_v13 = vsel %vm393_vm5, %v304_v42, %v424_v59  ;;  %v501_v28 = vadd.f32 %v500_v11, %v499_v19  ;;  %v433_v11 = vmul.f32 0.02, %v349_v61 }
 0x10b   :  { %v1974_v29 = vpop.f32.mrf.mxu0  ;;  %v502_v17 = vsel %vm3403_vm6, %v2463_v13, 0.0 }
 0x10c   :  { %v425_v4 = vmul.f32 0.02, %v309_v51  ;;  %vm394_vm7 = vcmp.ge.f32.partialorder %v309_v51, 0.0 }
 0x10d   :  { %v313_v35 = vpop.f32.mrf.mxu0 }
 0x10e   :  { %v314_v60 = vadd.f32 %v313_v35, %v2379_v8  ;;  %v2468_v20 = vsel %vm394_vm7, %v309_v51, %v425_v4  ;;  %v503_v35 = vadd.f32 %v502_v17, %v501_v28  ;;  %v359_v17 = vadd.f32 %v2362_v45, %v2379_v8 }
 0x10f   :  { %v1977_v44 = vpop.f32.mrf.mxu0  ;;  %v504_v33 = vsel %vm3403_vm6, %v2468_v20, 0.0  ;;  %v369_v45 = vadd.f32 %v2366_v53, %v2379_v8  ;;  %vm3402_vm7 = vcmask 74752  }
 0x110   :  { %v426_v14 = vmul.f32 0.02, %v314_v60  ;;  %vm395_vm8 = vcmp.ge.f32.partialorder %v314_v60, 0.0  ;;  %v505_v44 = vadd.f32 %v504_v33, %v503_v35  ;;  %v2510_v35 = vsel %vm402_vm14, %v349_v61, %v433_v11 }
 0x111   :  { %v318_v54 = vpop.f32.mrf.mxu0  ;;  %vm404_vm2 = vcmp.ge.f32.partialorder %v359_v17, 0.0  ;;  %v437_v61 = vmul.f32 0.02, %v369_v45  ;;  %vm406_vm4 = vcmp.ge.f32.partialorder %v369_v45, 0.0  ;;  %vm1345_vm14 = vcmask 130054  }
 0x112   :  { %v319_v6 = vadd.f32 %v318_v54, %v2379_v8  ;;  %v2472_v29 = vsel %vm395_vm8, %v314_v60, %v426_v14  ;;  %vm746_vm8 = vcmask 80900  }
 0x113   :  { %v1980_v62 = vpop.f32.mrf.mxu0  ;;  %v506_v42 = vsel %vm3403_vm6, %v2472_v29, 0.0 }
 0x114   :  { %v427_v21 = vmul.f32 0.02, %v319_v6  ;;  %vm396_vm9 = vcmp.ge.f32.partialorder %v319_v6, 0.0  ;;  %v507_v54 = vadd.f32 %v506_v42, %v505_v44  ;;  %v435_v42 = vmul.f32 0.02, %v359_v17 }
 0x115   :  { %v323_v7 = vpop.f32.mrf.mxu0 }
 0x116   :  { %v324_v15 = vadd.f32 %v323_v7, %v2379_v8  ;;  %v2477_v36 = vsel %vm396_vm9, %v319_v6, %v427_v21  ;;  %v354_v7 = vadd.f32 %v2360_v41, %v2379_v8  ;;  %vm748_vm9 = vcmask 78848  }
 0x117   :  { %v1983_v18 = vpop.f32.mrf.mxu0  ;;  %v508_v51 = vsel %vm3403_vm6, %v2477_v36, 0.0 }
 0x118   :  { %v428_v30 = vmul.f32 0.02, %v324_v15  ;;  %vm397_vm10 = vcmp.ge.f32.partialorder %v324_v15, 0.0  ;;  %v509_v2 = vadd.f32 %v508_v51, %v507_v54  ;;  %v434_v28 = vmul.f32 0.02, %v354_v7 }
 0x119   :  { %v328_v24 = vpop.f32.mrf.mxu0  ;;  %vm403_vm0 = vcmp.ge.f32.partialorder %v354_v7, 0.0  ;;  %v520_v54 = vsel %vm3403_vm6, %v2510_v35, 0.0 }
 0x11a   :  { %v329_v25 = vadd.f32 %v328_v24, %v2379_v8  ;;  %v2481_v46 = vsel %vm397_vm10, %v324_v15, %v428_v30  ;;  %vm1136_vm10 = vcmask 1041408  }
 0x11b   :  { %v1986_v34 = vpop.f32.mrf.mxu0  ;;  %v510_v60 = vsel %vm3403_vm6, %v2481_v46, 0.0 }
 0x11c   :  { %v429_v38 = vmul.f32 0.02, %v329_v25  ;;  %vm398_vm11 = vcmp.ge.f32.partialorder %v329_v25, 0.0  ;;  %v511_v14 = vadd.f32 %v510_v60, %v509_v2  ;;  %v364_v34 = vadd.f32 %v2364_v49, %v2379_v8 }
 0x11d   :  { %v333_v43 = vpop.f32.mrf.mxu0  ;;  %v374_v49 = vadd.f32 %v2368_v57, %v2379_v8 }
 0x11e   :  { %v334_v50 = vadd.f32 %v333_v43, %v2379_v8  ;;  %v2486_v55 = vsel %vm398_vm11, %v329_v25, %v429_v38  ;;  %vm405_vm3 = vcmp.ge.f32.partialorder %v364_v34, 0.0  ;;  %vm1341_vm11 = vcmask 1043458  }
 0x11f   :  { %v1989_v52 = vpop.f32.mrf.mxu0  ;;  %v512_v9 = vsel %vm3403_vm6, %v2486_v55, 0.0  ;;  %vm407_vm5 = vcmp.ge.f32.partialorder %v374_v49, 0.0 }
 0x120   :  { %vm399_vm12 = vcmp.ge.f32.partialorder %v334_v50, 0.0  ;;  %v430_v59 = vmul.f32 0.02, %v334_v50  ;;  %v513_v19 = vadd.f32 %v512_v9, %v511_v14  ;;  %v436_v52 = vmul.f32 0.02, %v364_v34 }
 0x121   :  { %v338_v62 = vpop.f32.mrf.mxu0 }
 0x122   :  { %v2492_v4 = vsel %vm399_vm12, %v334_v50, %v430_v59  ;;  %v339_v6 = vadd.f32 %v338_v62, %v2379_v8  ;;  %v2518_v50 = vsel %vm403_vm0, %v354_v7, %v434_v28  ;;  %v2524_v59 = vsel %vm404_vm2, %v359_v17, %v435_v42  ;;  %vm1342_vm12 = vmor %vm1341_vm11, %vm1136_vm10 }
 0x123   :  { %v1992_v12 = vpop.f32.mrf.mxu0  ;;  %v514_v37 = vsel %vm3403_vm6, %v2492_v4, 0.0  ;;  %v522_v53 = vsel %vm3403_vm6, %v2518_v50, 0.0  ;;  %v2528_v62 = vsel %vm405_vm3, %v364_v34, %v436_v52  ;;  %v524_v9 = vsel %vm3403_vm6, %v2524_v59, 0.0 }
 0x124   :  { %vm400_vm13 = vcmp.ge.f32.partialorder %v339_v6, 0.0  ;;  %v431_v15 = vmul.f32 0.02, %v339_v6  ;;  %v515_v25 = vadd.f32 %v514_v37, %v513_v19  ;;  %v526_v7 = vsel %vm3403_vm6, %v2528_v62, 0.0 }
 0x125   :  { %v343_v18 = vpop.f32.mrf.mxu0  ;;  %vm3412_vm2 = vcmask 162896   ;;  %vm809_vm3 = vcmask 244898   ;;  %vm3420_vm11 = vcmask 324848  }
 0x126   :  { %v2501_v21 = vsel %vm400_vm13, %v339_v6, %v431_v15  ;;  %v344_v24 = vadd.f32 %v343_v18, %v2379_v8  ;;  %v438_v6 = vmul.f32 0.02, %v374_v49  ;;  %v2532_v8 = vsel %vm406_vm4, %v369_v45, %v437_v61 }
 0x127   :  { %v516_v41 = vsel %vm3403_vm6, %v2501_v21, 0.0  ;;  %v1995_v30 = vpop.f32.mrf.mxu0  ;;  %v528_v15 = vsel %vm3403_vm6, %v2532_v8, 0.0  ;;  %vm1343_vm13 = vcmask 1045508   ;;  %vm3404_vm4 = vcmask 156752  }
 0x128   :  { %vm401_vm15 = vcmp.ge.f32.partialorder %v344_v24, 0.0  ;;  %v432_v33 = vmul.f32 0.02, %v344_v24  ;;  %v517_v38 = vadd.f32 %v516_v41, %v515_v25  ;;  %v2536_v14 = vsel %vm407_vm5, %v374_v49, %v438_v6 }
 0x129   :  { %v531_v37 = vsel %vm3402_vm7, %v2536_v14, 0.0  ;;  %vm772_vm5 = vcmask 162898  }
 0x12a   :  { %v2512_v43 = vsel %vm401_vm15, %v344_v24, %v432_v33  ;;  %vm1344_vm15 = vmor %vm1343_vm13, %vm1342_vm12  ;;  %vm3406_vm12 = vcmask 408896   ;;  %vm3405_vm13 = vcmask 402752  }
 0x12b   :  { %v518_v44 = vsel %vm3403_vm6, %v2512_v43, 0.0  ;;  %vm1346_vm0 = vmor %vm1345_vm14, %vm1344_vm15  ;;  %vm774_vm14 = vcmask 158800   ;;  %vm780_vm15 = vcmask 162900  }
 0x12c   :  { %v519_v51 = vadd.f32 %v518_v44, %v517_v38  ;;  %1347 = vst.msk [vmem:[#allocation3] sm:$0xff] %vm1346_vm0, %v2111_v1  ;;  %vm3418_vm0 = vcmask 490902  }
 0x12e   :  { %v521_v60 = vadd.f32 %v520_v54, %v519_v51 }
 0x130   :  { %v523_v2 = vadd.f32 %v522_v53, %v521_v60 }
 0x132   :  { %v525_v57 = vadd.f32 %v524_v9, %v523_v2 }
 0x134   :  { %v527_v12 = vadd.f32 %v526_v7, %v525_v57 }
 0x136   :  { %v529_v11 = vadd.f32 %v528_v15, %v527_v12 }
 0x138   :  { %v532_v18 = vadd.f32 %v531_v37, %v529_v11 }
 0x13a   :  { %v533_v19 = vrot.slane %v532_v18, 4 }
 0x13c   :  { %v534_v17 = vadd.f32 %v533_v19, %v532_v18 }
 0x13e   :  { %v535_v24 = vrot.slane %v534_v17, 2 }
 0x140   :  { %v536_v28 = vadd.f32 %v535_v24, %v534_v17 }
 0x142   :  { %v537_v41 = vrot.slane %v536_v28, 1 }
 0x144   :  { %v538_v30 = vadd.f32 %v537_v41, %v536_v28 }
 0x146   :  { %v2542_v25 = vmul.f32 0.004132231, %v538_v30 }
 0x148   :  { %v2546_v33 = vsub.f32 %v2389_v26, %v2542_v25  ;;  %v2550_v34 = vsub.f32 %v2386_v22, %v2542_v25  ;;  %v2554_v38 = vsub.f32 %v2391_v27, %v2542_v25  ;;  %v2560_v45 = vsub.f32 %v2396_v32, %v2542_v25 }
 0x149   :  { %v2566_v26 = vsub.f32 %v2403_v40, %v2542_v25  ;;  %v2573_v51 = vsub.f32 %v2408_v48, %v2542_v25  ;;  %v2580_v54 = vsub.f32 %v2413_v56, %v2542_v25  ;;  %v2587_v48 = vsub.f32 %v2418_v63, %v2542_v25 }
 0x14a   :  { %v572_v42 = vmul.f32 %v2546_v33, %v2546_v33  ;;  %v573_v44 = vmul.f32 %v2550_v34, %v2550_v34  ;;  %v574_v22 = vmul.f32 %v2554_v38, %v2554_v38  ;;  %v575_v32 = vmul.f32 %v2560_v45, %v2560_v45 }
 0x14b   :  { %v576_v40 = vmul.f32 %v2566_v26, %v2566_v26  ;;  %v577_v53 = vmul.f32 %v2573_v51, %v2573_v51  ;;  %v2594_v56 = vsub.f32 %v2423_v10, %v2542_v25  ;;  %v578_v9 = vmul.f32 %v2580_v54, %v2580_v54 }
 0x14c   :  { %v603_v27 = vsel %vm3403_vm6, %v572_v42, 0.0  ;;  %v604_v52 = vsel %vm3403_vm6, %v573_v44, 0.0  ;;  %v606_v60 = vsel %vm3403_vm6, %v574_v22, 0.0  ;;  %v608_v2 = vsel %vm3403_vm6, %v575_v32, 0.0 }
 0x14d   :  { %v605_v49 = vadd.f32 %v604_v52, %v603_v27  ;;  %v610_v57 = vsel %vm3403_vm6, %v576_v40, 0.0  ;;  %v2601_v63 = vsub.f32 %v2428_v16, %v2542_v25  ;;  %v579_v12 = vmul.f32 %v2587_v48, %v2587_v48 }
 0x14e   :  { %v612_v15 = vsel %vm3403_vm6, %v577_v53, 0.0  ;;  %v2608_v10 = vsub.f32 %v2433_v23, %v2542_v25  ;;  %v580_v37 = vmul.f32 %v2594_v56, %v2594_v56  ;;  %v614_v18 = vsel %vm3403_vm6, %v578_v9, 0.0 }
 0x14f   :  { %v607_v61 = vadd.f32 %v606_v60, %v605_v49  ;;  %v2615_v16 = vsub.f32 %v2438_v31, %v2542_v25  ;;  %v581_v17 = vmul.f32 %v2601_v63, %v2601_v63  ;;  %v616_v24 = vsel %vm3403_vm6, %v579_v12, 0.0 }
 0x150   :  { %v2622_v23 = vsub.f32 %v2443_v39, %v2542_v25  ;;  %v582_v41 = vmul.f32 %v2608_v10, %v2608_v10  ;;  %v618_v30 = vsel %vm3403_vm6, %v580_v37, 0.0  ;;  %v2629_v31 = vsub.f32 %v2448_v47, %v2542_v25 }
 0x151   :  { %v609_v6 = vadd.f32 %v608_v2, %v607_v61  ;;  %v583_v44 = vmul.f32 %v2615_v16, %v2615_v16  ;;  %v620_v22 = vsel %vm3403_vm6, %v581_v17, 0.0  ;;  %v2636_v39 = vsub.f32 %v2453_v58, %v2542_v25 }
 0x152   :  { %v584_v32 = vmul.f32 %v2622_v23, %v2622_v23  ;;  %v622_v52 = vsel %vm3403_vm6, %v582_v41, 0.0  ;;  %v2643_v47 = vsub.f32 %v2458_v3, %v2542_v25  ;;  %v585_v40 = vmul.f32 %v2629_v31, %v2629_v31 }
 0x153   :  { %v611_v7 = vadd.f32 %v610_v57, %v609_v6  ;;  %v624_v60 = vsel %vm3403_vm6, %v583_v44, 0.0  ;;  %v2650_v58 = vsub.f32 %v2463_v13, %v2542_v25  ;;  %v586_v53 = vmul.f32 %v2636_v39, %v2636_v39 }
 0x154   :  { %v626_v2 = vsel %vm3403_vm6, %v584_v32, 0.0  ;;  %v2657_v3 = vsub.f32 %v2468_v20, %v2542_v25  ;;  %v587_v9 = vmul.f32 %v2643_v47, %v2643_v47  ;;  %v628_v57 = vsel %vm3403_vm6, %v585_v40, 0.0 }
 0x155   :  { %v613_v11 = vadd.f32 %v612_v15, %v611_v7  ;;  %v2664_v13 = vsub.f32 %v2472_v29, %v2542_v25  ;;  %v588_v12 = vmul.f32 %v2650_v58, %v2650_v58  ;;  %v630_v15 = vsel %vm3403_vm6, %v586_v53, 0.0 }
 0x156   :  { %v2671_v20 = vsub.f32 %v2477_v36, %v2542_v25  ;;  %v589_v37 = vmul.f32 %v2657_v3, %v2657_v3  ;;  %v2678_v29 = vsub.f32 %v2481_v46, %v2542_v25  ;;  %v2685_v36 = vsub.f32 %v2486_v55, %v2542_v25 }
 0x157   :  { %v615_v19 = vadd.f32 %v614_v18, %v613_v11  ;;  %v632_v18 = vsel %vm3403_vm6, %v587_v9, 0.0  ;;  %v590_v17 = vmul.f32 %v2664_v13, %v2664_v13  ;;  %v2692_v46 = vsub.f32 %v2492_v4, %v2542_v25 }
 0x158   :  { %v591_v41 = vmul.f32 %v2671_v20, %v2671_v20  ;;  %v592_v44 = vmul.f32 %v2678_v29, %v2678_v29  ;;  %v2699_v55 = vsub.f32 %v2501_v21, %v2542_v25  ;;  %v593_v32 = vmul.f32 %v2685_v36, %v2685_v36 }
 0x159   :  { %v617_v28 = vadd.f32 %v616_v24, %v615_v19  ;;  %v634_v24 = vsel %vm3403_vm6, %v588_v12, 0.0  ;;  %v565_v4 = vsub.f32 %v2512_v43, %v2542_v25  ;;  %v594_v40 = vmul.f32 %v2692_v46, %v2692_v46 }
 0x15a   :  { %v2711_v53 = vsub.f32 %v2510_v35, %v2542_v25  ;;  %v595_v21 = vmul.f32 %v2699_v55, %v2699_v55  ;;  %v2718_v9 = vsub.f32 %v2518_v50, %v2542_v25  ;;  %v2723_v12 = vsub.f32 %v2524_v59, %v2542_v25 }
 0x15b   :  { %v619_v42 = vadd.f32 %v618_v30, %v617_v28  ;;  %v636_v30 = vsel %vm3403_vm6, %v589_v37, 0.0  ;;  %v596_v43 = vmul.f32 %v565_v4, %v565_v4  ;;  %v2730_v37 = vsub.f32 %v2528_v62, %v2542_v25 }
 0x15c   :  { %v597_v35 = vmul.f32 %v2711_v53, %v2711_v53  ;;  %v598_v50 = vmul.f32 %v2718_v9, %v2718_v9  ;;  %v2737_v59 = vsub.f32 %v2532_v8, %v2542_v25  ;;  %v2744_v62 = vsub.f32 %v2536_v14, %v2542_v25 }
 0x15d   :  { %v621_v27 = vadd.f32 %v620_v22, %v619_v42  ;;  %v638_v22 = vsel %vm3403_vm6, %v590_v17, 0.0  ;;  %v599_v17 = vmul.f32 %v2723_v12, %v2723_v12 }
 0x15e   :  { %v601_v8 = vmul.f32 %v2737_v59, %v2737_v59 }
 0x15f   :  { %v623_v49 = vadd.f32 %v622_v52, %v621_v27  ;;  %v640_v52 = vsel %vm3403_vm6, %v591_v41, 0.0  ;;  %v600_v41 = vmul.f32 %v2730_v37, %v2730_v37 }
 0x160   :  { %v660_v14 = vsel %vm3403_vm6, %v601_v8, 0.0 }
 0x161   :  { %v625_v61 = vadd.f32 %v624_v60, %v623_v49  ;;  %v642_v60 = vsel %vm3403_vm6, %v592_v44, 0.0  ;;  %v656_v44 = vsel %vm3403_vm6, %v599_v17, 0.0 }
 0x163   :  { %v627_v6 = vadd.f32 %v626_v2, %v625_v61  ;;  %v644_v2 = vsel %vm3403_vm6, %v593_v32, 0.0  ;;  %v658_v32 = vsel %vm3403_vm6, %v600_v41, 0.0 }
 0x165   :  { %v629_v7 = vadd.f32 %v628_v57, %v627_v6  ;;  %v646_v57 = vsel %vm3403_vm6, %v594_v40, 0.0 }
 0x167   :  { %v631_v11 = vadd.f32 %v630_v15, %v629_v7  ;;  %v648_v15 = vsel %vm3403_vm6, %v595_v21, 0.0 }
 0x169   :  { %v633_v19 = vadd.f32 %v632_v18, %v631_v11  ;;  %v650_v18 = vsel %vm3403_vm6, %v596_v43, 0.0 }
 0x16b   :  { %v635_v28 = vadd.f32 %v634_v24, %v633_v19  ;;  %v652_v24 = vsel %vm3403_vm6, %v597_v35, 0.0  ;;  %v676_v35 = vsub.s32 1, %v2370_v0 }
 0x16d   :  { %v637_v42 = vadd.f32 %v636_v30, %v635_v28  ;;  %v654_v30 = vsel %vm3403_vm6, %v598_v50, 0.0 }
 0x16f   :  { %v639_v27 = vadd.f32 %v638_v22, %v637_v42 }
 0x171   :  { %v641_v49 = vadd.f32 %v640_v52, %v639_v27  ;;  %v602_v27 = vmul.f32 %v2744_v62, %v2744_v62 }
 0x173   :  { %v643_v61 = vadd.f32 %v642_v60, %v641_v49  ;;  %v662_v49 = vsel %vm3402_vm7, %v602_v27, 0.0 }
 0x175   :  { %v645_v6 = vadd.f32 %v644_v2, %v643_v61 }
 0x177   :  { %v647_v7 = vadd.f32 %v646_v57, %v645_v6 }
 0x179   :  { %v649_v11 = vadd.f32 %v648_v15, %v647_v7  ;;  %v711_v15 = vsub.s32 2, %v2370_v0 }
 0x17b   :  { %v651_v19 = vadd.f32 %v650_v18, %v649_v11 }
 0x17d   :  { %v653_v28 = vadd.f32 %v652_v24, %v651_v19  ;;  %v2763_v19 = vrot.slane %v2376_v5, %v711_v15  ;;  %v1108_v15 = vld [vmem:[%s3398_s2 + $0x50] sm:$0xff] }
 0x17f   :  { %v655_v42 = vadd.f32 %v654_v30, %v653_v28 }
 0x181   :  { %v657_v22 = vadd.f32 %v656_v44, %v655_v42 }
 0x183   :  { %v659_v52 = vadd.f32 %v658_v32, %v657_v22 }
 0x185   :  { %v661_v25 = vadd.f32 %v660_v14, %v659_v52 }
 0x187   :  { %v663_v40 = vadd.f32 %v662_v49, %v661_v25 }
 0x189   :  { %v664_v60 = vrot.slane %v663_v40, 4 }
 0x18b   :  { %v665_v61 = vadd.f32 %v664_v60, %v663_v40 }
 0x18d   :  { %v666_v21 = vrot.slane %v665_v61, 2 }
 0x18f   :  { %v667_v2 = vadd.f32 %v666_v21, %v665_v61 }
 0x191   :  { %v668_v6 = vrot.slane %v667_v2, 1 }
 0x193   :  { %v669_v43 = vadd.f32 %v668_v6, %v667_v2 }
 0x195   :  { %v670_v57 = vmul.f32 0.004132231, %v669_v43 }
 0x197   :  { %v671_v7 = vadd.f32 1e-05, %v670_v57 }
 0x199   :  { %2082 = vrsqrt.f32 %v671_v7  ;;  %v1109_v7 = vld [vmem:[%s3398_s2 + $0x58] sm:$0x3] }
 0x19a   :  { %2015 = vmatpush3.msk.msra.mxu1 %vm1136_vm10, %v1109_v7  ;;  %vm3417_vm10 = vcmask 326900  }
 0x19b   :  { %2016 = vmatprep.subr.mxu1 %v2111_v1 }
 0x19c   :  { %2017 = vmatpush3.msra.mxu1 %v1108_v15 }
 0x19d   :  { %2018 = vmatprep.subr.mxu1 %v2111_v1 }
 0x1a6   :  { %v2083_v11 = vpop.eup %2082 }
 0x1a7   :  { %v673_v50 = vmul.f32 %v2083_v11, %v2376_v5  ;;  %v1107_v11 = vld [vmem:[%s3398_s2 + $0x48] sm:$0xff] }
 0x1a8   :  { %2019 = vmatpush3.msra.mxu1 %v1107_v11 }
 0x1a9   :  { %v2760_v18 = vrot.slane %v673_v50, %v676_v35  ;;  %v1106_v50 = vld [vmem:[%s3398_s2 + $0x40] sm:$0xff]  ;;  %2020 = vmatprep.subr.mxu1 %v2111_v1 }
 0x1aa   :  { %2021 = vmatpush3.msra.mxu1 %v1106_v50 }
 0x1ab   :  { %v687_v17 = vmul.f32 %v2760_v18, %v2601_v63  ;;  %v678_v24 = vmul.f32 %v2760_v18, %v2546_v33  ;;  %v679_v28 = vmul.f32 %v2760_v18, %v2550_v34  ;;  %v702_v41 = vmul.f32 %v2760_v18, %v565_v4  ;;  %2022 = vmatprep.subr.mxu1 %v2111_v1 }
 0x1ac   :  { %v688_v5 = vmul.f32 %v2760_v18, %v2608_v10  ;;  %v694_v33 = vmul.f32 %v2760_v18, %v2650_v58  ;;  %v695_v34 = vmul.f32 %v2760_v18, %v2657_v3  ;;  %v680_v63 = vmul.f32 %v2760_v18, %v2554_v38 }
 0x1ad   :  { %v722_v30 = vadd.f32 %v2763_v19, %v687_v17  ;;  %v713_v42 = vadd.f32 %v2763_v19, %v678_v24  ;;  %v2777_v8 = vadd.f32 %v2763_v19, %v679_v28  ;;  %v681_v10 = vmul.f32 %v2760_v18, %v2560_v45  ;;  %v1105_v28 = vld [vmem:[%s3398_s2 + $0x38] sm:$0xff] }
 0x1ae   :  { %v2795_v4 = vadd.f32 %v2763_v19, %v688_v5  ;;  %v703_v44 = vmul.f32 %v2760_v18, %v2711_v53  ;;  %v2800_v58 = vadd.f32 %v2763_v19, %v680_v63  ;;  %v682_v3 = vmul.f32 %v2760_v18, %v2566_v26  ;;  %2023 = vmatpush3.msra.mxu1 %v1105_v28  ;;  %v1102_v5 = vld [vmem:[%s3398_s2 + $0x20] sm:$0xff]  ;;  %v1100_v63 = vld [vmem:[%s3398_s2 + $0x10] sm:$0xff] }
 0x1af   :  { %758 = vrot.lane.b32.xlu0 %v722_v30, %s2113_s7  ;;  %803 = vrot.lane.b32.xlu1 %v713_v42, %s2114_s8  ;;  %744 = vst.msk [vmem:[#allocation2] sm:$0xff] %vm3403_vm6, %v713_v42  ;;  %v2805_v38 = vadd.f32 %v2763_v19, %v681_v10  ;;  %v2812_v45 = vadd.f32 %v2763_v19, %v694_v33  ;;  %v1103_v30 = vld [vmem:[%s3398_s2 + $0x28] sm:$0xff]  ;;  %v1101_v33 = vld [vmem:[%s3398_s2 + $0x18] sm:$0xff] }
 0x1b0   :  { %745 = vst.msk [vmem:[#allocation2 + $0x8] sm:$0x3] %vm3402_vm7, %v2777_v8  ;;  %v2815_v53 = vadd.f32 %v2763_v19, %v695_v34  ;;  %v2818_v22 = vadd.f32 %v2763_v19, %v682_v3  ;;  %v691_v26 = vmul.f32 %v2760_v18, %v2629_v31  ;;  %v683_v27 = vmul.f32 %v2760_v18, %v2573_v51 }
 0x1b1   :  { %747 = vst.msk [vmem:[#allocation2 + $0x6] sm:$0xf0] %vm746_vm8, %v2777_v8  ;;  %v699_v32 = vmul.f32 %v2760_v18, %v2685_v36  ;;  %v700_v52 = vmul.f32 %v2760_v18, %v2692_v46  ;;  %v737_v14 = vadd.f32 %v2763_v19, %v702_v41  ;;  %v738_v25 = vadd.f32 %v2763_v19, %v703_v44 }
 0x1b2   :  { %749 = vst.msk [vmem:[#allocation2 + $0xe] sm:$0x3f] %vm748_vm9, %v2800_v58  ;;  %v706_v49 = vmul.f32 %v2760_v18, %v2730_v37  ;;  %v684_v31 = vmul.f32 %v2760_v18, %v2580_v54  ;;  %v2843_v51 = vadd.f32 %v2763_v19, %v691_v26  ;;  %v2846_v36 = vadd.f32 %v2763_v19, %v683_v27 }
 0x1b3   :  { %760 = vrot.lane.b32.xlu0 %v2795_v4, %s2113_s7  ;;  %805 = vrot.lane.b32.xlu1 %v2777_v8, %s2114_s8  ;;  %750 = vst.msk [vmem:[#allocation2 + $0x14] sm:$0xff] %vm3403_vm6, %v2805_v38  ;;  %v2849_v46 = vadd.f32 %v2763_v19, %v699_v32  ;;  %v2852_v40 = vadd.f32 %v2763_v19, %v700_v52 }
 0x1b4   :  { %751 = vst.msk [vmem:[#allocation2 + $0x1c] sm:$0x3] %vm3402_vm7, %v2818_v22  ;;  %v2859_v54 = vadd.f32 %v2763_v19, %v706_v49  ;;  %v2862_v37 = vadd.f32 %v2763_v19, %v684_v31  ;;  %v692_v60 = vmul.f32 %v2760_v18, %v2636_v39  ;;  %v693_v61 = vmul.f32 %v2760_v18, %v2643_v47 }
 0x1b5   :  { %752 = vst.msk [vmem:[#allocation2 + $0x1a] sm:$0xf0] %vm746_vm8, %v2818_v22  ;;  %v685_v21 = vmul.f32 %v2760_v18, %v2587_v48  ;;  %v701_v2 = vmul.f32 %v2760_v18, %v2699_v55  ;;  %v707_v6 = vmul.f32 %v2760_v18, %v2737_v59  ;;  %v689_v43 = vmul.f32 %v2760_v18, %v2615_v16 }
 0x1b6   :  { %753 = vst.msk [vmem:[#allocation2 + $0x22] sm:$0x3f] %vm748_vm9, %v2846_v36  ;;  %v2881_v39 = vadd.f32 %v2763_v19, %v692_v60  ;;  %v708_v48 = vmul.f32 %v2760_v18, %v2744_v62  ;;  %v686_v47 = vmul.f32 %v2760_v18, %v2594_v56  ;;  %v2888_v55 = vadd.f32 %v2763_v19, %v693_v61 }
 0x1b7   :  { %849 = vrot.lane.b32.xlu0 %v2812_v45, %s2115_s9  ;;  %851 = vrot.lane.b32.xlu1 %v2815_v53, %s2115_s9  ;;  %754 = vst.msk [vmem:[#allocation2 + $0x28] sm:$0xff] %vm3403_vm6, %v2862_v37  ;;  %v2891_v59 = vadd.f32 %v2763_v19, %v685_v21  ;;  %v2894_v16 = vadd.f32 %v2763_v19, %v701_v2  ;;  %vm3416_vm8 = vcmask 240800   ;;  %vm817_vm9 = vcmask 244902  }
 0x1b8   :  { %v2897_v57 = vadd.f32 %v2763_v19, %v707_v6  ;;  %v2905_v56 = vadd.f32 %v2763_v19, %v708_v48  ;;  %v2908_v62 = vadd.f32 %v2763_v19, %v686_v47  ;;  %v724_v35 = vadd.f32 %v2763_v19, %v689_v43  ;;  %2024 = vmatprep.subr.mxu1 %v2111_v1 }
 0x1b9   :  { %755 = vst.msk [vmem:[#allocation2 + $0x30] sm:$0x3] %vm3402_vm7, %v2891_v59  ;;  %v696_v17 = vmul.f32 %v2760_v18, %v2664_v13  ;;  %v697_v24 = vmul.f32 %v2760_v18, %v2671_v20  ;;  %v1104_v13 = vld [vmem:[%s3398_s2 + $0x30] sm:$0xff]  ;;  %v704_v42 = vmul.f32 %v2760_v18, %v2718_v9  ;;  %v690_v34 = vmul.f32 %v2760_v18, %v2622_v23  ;;  %v1099_v23 = vld [vmem:[%s3398_s2 + $0x8] sm:$0xff] }
 0x1ba   :  { %2025 = vmatpush3.msra.mxu1 %v1104_v13  ;;  %vm3408_vm7 = vcmask 244896   ;;  %vm3410_vm6 = vcmask 572900  }
 0x1bb   :  { %895 = vrot.lane.b32.xlu0 %v737_v14, %s2116_s12  ;;  %897 = vrot.lane.b32.xlu1 %v738_v25, %s2116_s12  ;;  %v731_v20 = vadd.f32 %v2763_v19, %v696_v17  ;;  %v732_v41 = vadd.f32 %v2763_v19, %v697_v24  ;;  %v739_v9 = vadd.f32 %v2763_v19, %v704_v42 }
 0x1bc   :  { %2026 = vmatprep.subr.mxu1 %v2111_v1  ;;  %v725_v10 = vadd.f32 %v2763_v19, %v690_v34 }
 0x1bd   :  { %2027 = vmatpush3.msra.mxu1 %v1103_v30 }
 0x1be   :  { %2028 = vmatprep.subr.mxu1 %v2111_v1 }
 0x1bf   :  { %769 = vrot.lane.b32.xlu0 %v724_v35, %s2113_s7  ;;  %938 = vrot.lane.b32.xlu1 %v2812_v45, %s2117_s15 }
 0x1c0   :  { %2029 = vmatpush3.msra.mxu1 %v1102_v5 }
 0x1c1   :  { %2030 = vmatprep.subr.mxu1 %v2111_v1 }
 0x1c2   :  { %2031 = vmatpush3.msra.mxu1 %v1101_v33 }
 0x1c3   :  { %940 = vrot.lane.b32.xlu0 %v2815_v53, %s2117_s15  ;;  %814 = vrot.lane.b32.xlu1 %v2800_v58, %s2114_s8 }
 0x1c4   :  { %2032 = vmatprep.subr.mxu1 %v2111_v1 }
 0x1c5   :  { %2033 = vmatpush3.msra.mxu1 %v1100_v63 }
 0x1c6   :  { %2034 = vmatprep.subr.mxu1 %v2111_v1 }
 0x1c7   :  { %976 = vrot.lane.b32.xlu0 %v2777_v8, %s2118_s22  ;;  %978 = vrot.lane.b32.xlu1 %v2800_v58, %s2118_s22 }
 0x1c8   :  { %2035 = vmatpush3.msra.mxu1 %v1099_v23 }
 0x1c9   :  { %2036 = vmatprep.subr.mxu1 %v2111_v1 }
 0x1cb   :  { %861 = vrot.lane.b32.xlu0 %v731_v20, %s2115_s9  ;;  %863 = vrot.lane.b32.xlu1 %v732_v41, %s2115_s9 }
 0x1cf   :  { %1015 = vrot.lane.b32.xlu0 %v2795_v4, %s2119_s28  ;;  %1017 = vrot.lane.b32.xlu1 %v724_v35, %s2119_s28  ;;  %v698_v4 = vmul.f32 %v2760_v18, %v2678_v29 }
 0x1d1   :  { %v733_v44 = vadd.f32 %v2763_v19, %v698_v4 }
 0x1d3   :  { %906 = vrot.lane.b32.xlu0 %v739_v9, %s2116_s12  ;;  %1053 = vrot.lane.b32.xlu1 %v2777_v8, %s2120_s10  ;;  %v1098_v8 = vld [vmem:[%s3398_s2] sm:$0xff] }
 0x1d4   :  { %2037 = vmatpush3.msra.mxu1 %v1098_v8 }
 0x1d7   :  { %1055 = vrot.lane.b32.xlu0 %v2800_v58, %s2120_s10  ;;  %777 = vrot.lane.b32.xlu1 %v725_v10, %s2113_s7  ;;  %v705_v58 = vmul.f32 %v2760_v18, %v2723_v12 }
 0x1d9   :  { %v740_v3 = vadd.f32 %v2763_v19, %v705_v58 }
 0x1db   :  { %948 = vrot.lane.b32.xlu0 %v731_v20, %s2117_s15  ;;  %950 = vrot.lane.b32.xlu1 %v732_v41, %s2117_s15 }
 0x1df   :  { %823 = vrot.lane.b32.xlu0 %v2805_v38, %s2114_s8  ;;  %825 = vrot.lane.b32.xlu1 %v2818_v22, %s2114_s8 }
 0x1e3   :  { %986 = vrot.lane.b32.xlu0 %v2805_v38, %s2118_s22  ;;  %988 = vrot.lane.b32.xlu1 %v2818_v22, %s2118_s22 }
 0x1e7   :  { %872 = vrot.lane.b32.xlu0 %v733_v44, %s2115_s9  ;;  %1025 = vrot.lane.b32.xlu1 %v725_v10, %s2119_s28 }
 0x1eb   :  { %914 = vrot.lane.b32.xlu0 %v740_v3, %s2116_s12  ;;  %1063 = vrot.lane.b32.xlu1 %v2805_v38, %s2120_s10 }
 0x1ef   :  { %785 = vrot.lane.b32.xlu0 %v2843_v51, %s2113_s7  ;;  %958 = vrot.lane.b32.xlu1 %v733_v44, %s2117_s15 }
 0x1f3   :  { %832 = vrot.lane.b32.xlu0 %v2846_v36, %s2114_s8  ;;  %996 = vrot.lane.b32.xlu1 %v2846_v36, %s2118_s22 }
 0x1f7   :  { %879 = vrot.lane.b32.xlu0 %v2849_v46, %s2115_s9  ;;  %881 = vrot.lane.b32.xlu1 %v2852_v40, %s2115_s9 }
 0x1fb   :  { %1032 = vrot.lane.b32.xlu0 %v2843_v51, %s2119_s28  ;;  %922 = vrot.lane.b32.xlu1 %v2859_v54, %s2116_s12 }
 0x1ff   :  { %1065 = vrot.lane.b32.xlu0 %v2818_v22, %s2120_s10  ;;  %1073 = vrot.lane.b32.xlu1 %v2846_v36, %s2120_s10 }
 0x203   :  { %963 = vrot.lane.b32.xlu0 %v2849_v46, %s2117_s15  ;;  %965 = vrot.lane.b32.xlu1 %v2852_v40, %s2117_s15 }
 0x207   :  { %1001 = vrot.lane.b32.xlu0 %v2862_v37, %s2118_s22  ;;  %1039 = vrot.lane.b32.xlu1 %v2881_v39, %s2119_s28 }
 0x20b   :  { %1078 = vrot.lane.b32.xlu0 %v2862_v37, %s2120_s10  ;;  %793 = vrot.lane.b32.xlu1 %v2881_v39, %s2113_s7 }
 0x20f   :  { %795 = vrot.lane.b32.xlu0 %v2888_v55, %s2113_s7  ;;  %839 = vrot.lane.b32.xlu1 %v2862_v37, %s2114_s8 }
 0x213   :  { %841 = vrot.lane.b32.xlu0 %v2891_v59, %s2114_s8  ;;  %1003 = vrot.lane.b32.xlu1 %v2891_v59, %s2118_s22  ;;  %s2123_s8 = smov 16  }
 0x217   :  { %888 = vrot.lane.b32.xlu0 %v2894_v16, %s2115_s9  ;;  %1041 = vrot.lane.b32.xlu1 %v2888_v55, %s2119_s28 }
 0x21b   :  { %930 = vrot.lane.b32.xlu0 %v2897_v57, %s2116_s12  ;;  %932 = vrot.lane.b32.xlu1 %v2905_v56, %s2116_s12 }
 0x21f   :  { %1080 = vrot.lane.b32.xlu0 %v2891_v59, %s2120_s10  ;;  %971 = vrot.lane.b32.xlu1 %v2894_v16, %s2117_s15  ;;  %s2125_s15 = smov 96  }
 0x221   :  { %v759_v29 = vpop.permute.xlu0 %758  ;;  %v804_v12 = vpop.permute.xlu1 %803 }
 0x222   :  { %765 = vst.msk [vmem:[#allocation2] sm:$0xff] %vm3412_vm2, %v759_v29  ;;  %vm788_vm2 = vcmask 162902  }
 0x223   :  { %810 = vst.msk [vmem:[#allocation2 - $0x2] sm:$0xfc] %vm809_vm3, %v804_v12  ;;  %1010 = vrot.lane.b32.xlu0 %v2908_v62, %s2118_s22  ;;  %1048 = vrot.lane.b32.xlu1 %v2812_v45, %s2119_s28 }
 0x225   :  { %v761_v18 = vpop.permute.xlu0 %760  ;;  %v806_v19 = vpop.permute.xlu1 %805 }
 0x226   :  { %767 = vst.msk [vmem:[#allocation2 + $0x8] sm:$0x3] %vm3404_vm4, %v761_v18  ;;  %vm3409_vm4 = vcmask 570848  }
 0x227   :  { %773 = vst.msk [vmem:[#allocation2 + $0x8] sm:$0xfc] %vm772_vm5, %v761_v18  ;;  %1086 = vrot.lane.b32.xlu0 %v2908_v62, %s2120_s10  ;;  %vm3407_vm5 = vcmask 490896  }
 0x228   :  { %812 = vst.msk [vmem:[#allocation2 + $0x6] sm:$0xf] %vm3416_vm8, %v806_v19 }
 0x229   :  { %818 = vst.msk [vmem:[#allocation2 + $0x4] sm:$0xc0] %vm817_vm9, %v806_v19  ;;  %v850_v38 = vpop.permute.xlu0 %849  ;;  %v852_v45 = vpop.permute.xlu1 %851 }
 0x22a   :  { %856 = vst.msk [vmem:[#allocation2 - $0x4] sm:$0xf0] %vm3417_vm10, %v850_v38 }
 0x22b   :  { %858 = vst.msk [vmem:[#allocation2 + $0x4] sm:$0x3f] %vm3420_vm11, %v852_v45 }
 0x22d   :  { %v896_v53 = vpop.permute.xlu0 %895  ;;  %v898_v22 = vpop.permute.xlu1 %897 }
 0x22e   :  { %902 = vst.msk [vmem:[#allocation2] sm:$0xff] %vm3406_vm12, %v896_v53  ;;  %vm3413_vm12 = vcmask 654898  }
 0x22f   :  { %904 = vst.msk [vmem:[#allocation2 + $0x8] sm:$0x3] %vm3405_vm13, %v898_v22  ;;  %vm909_vm13 = vcmask 408898  }
 0x231   :  { %v770_v26 = vpop.permute.xlu0 %769  ;;  %v939_v27 = vpop.permute.xlu1 %938 }
 0x232   :  { %775 = vst.msk [vmem:[#allocation2 + $0x10] sm:$0xf] %vm774_vm14, %v770_v26  ;;  %vm3411_vm14 = vcmask 326896  }
 0x233   :  { %781 = vst.msk [vmem:[#allocation2 + $0x10] sm:$0xf0] %vm780_vm15, %v770_v26  ;;  %vm869_vm15 = vcmask 320752  }
 0x234   :  { %945 = vst.msk [vmem:[#allocation2 - $0x6] sm:$0xc0] %vm3418_vm0, %v939_v27 }
 0x235   :  { %v941_v32 = vpop.permute.xlu0 %940  ;;  %v815_v52 = vpop.permute.xlu1 %814 }
 0x236   :  { %947 = vst.msk [vmem:[#allocation2 + $0x2] sm:$0xff] %vm3407_vm5, %v941_v32  ;;  %vm3414_vm5 = vcmask 650800  }
 0x237   :  { %820 = vst.msk [vmem:[#allocation2 + $0xc] sm:$0xff] %vm3408_vm7, %v815_v52  ;;  %vm911_vm7 = vcmask 404800  }
 0x239   :  { %v977_v14 = vpop.permute.xlu0 %976  ;;  %v979_v25 = vpop.permute.xlu1 %978 }
 0x23a   :  { %983 = vst.msk [vmem:[#allocation2 - $0x4] sm:$0xf0] %vm3410_vm6, %v977_v14  ;;  %vm1061_vm6 = vcmask 736896  }
 0x23b   :  { %985 = vst.msk [vmem:[#allocation2 + $0x4] sm:$0x3f] %vm3409_vm4, %v979_v25  ;;  %vm1059_vm4 = vcmask 736902  }
 0x23d   :  { %v862_v49 = vpop.permute.xlu0 %861  ;;  %v864_v31 = vpop.permute.xlu1 %863 }
 0x23e   :  { %868 = vst.msk [vmem:[#allocation2 + $0xa] sm:$0xff] %vm3411_vm14, %v862_v49  ;;  %vm782_vm14 = vcmask 160848   ;;  %v1112_v49 = vsub.s32 3, %v2370_v0 }
 0x23f   :  { %870 = vst.msk [vmem:[#allocation2 + $0x12] sm:$0x3] %vm869_vm15, %v864_v31 }
 0x240   :  { %910 = vst.msk [vmem:[#allocation2 + $0x8] sm:$0xfc] %vm909_vm13, %v898_v22  ;;  %vm954_vm13 = vcmask 490898  }
 0x241   :  { %v1016_v51 = vpop.permute.xlu0 %1015  ;;  %v1018_v36 = vpop.permute.xlu1 %1017 }
 0x242   :  { %1022 = vst.msk [vmem:[#allocation2 - $0x2] sm:$0xfc] %vm3413_vm12, %v1016_v51  ;;  %vm3415_vm12 = vcmask 486800  }
 0x243   :  { %1024 = vst.msk [vmem:[#allocation2 + $0x6] sm:$0xf] %vm3414_vm5, %v1018_v36  ;;  %vm917_vm5 = vcmask 408900  }
 0x245   :  { %v907_v46 = vpop.permute.xlu0 %906  ;;  %v1054_v40 = vpop.permute.xlu1 %1053 }
 0x246   :  { %912 = vst.msk [vmem:[#allocation2 + $0x10] sm:$0xf] %vm911_vm7, %v907_v46  ;;  %vm1114_vm7 = vcmask 736256  }
 0x247   :  { %1060 = vst.msk [vmem:[#allocation2 - $0x6] sm:$0xc0] %vm1059_vm4, %v1054_v40 }
 0x249   :  { %v1056_v54 = vpop.permute.xlu0 %1055  ;;  %v778_v37 = vpop.permute.xlu1 %777 }
 0x24a   :  { %1062 = vst.msk [vmem:[#allocation2 + $0x2] sm:$0xff] %vm1061_vm6, %v1056_v54 }
 0x24b   :  { %783 = vst.msk [vmem:[#allocation2 + $0x18] sm:$0x3f] %vm782_vm14, %v778_v37  ;;  %vm3419_vm14 = vcmask 566752  }
 0x24c   :  { %789 = vst.msk [vmem:[#allocation2 + $0x18] sm:$0xc0] %vm788_vm2, %v778_v37  ;;  %vm992_vm2 = vcmask 572896  }
 0x24d   :  { %v949_v60 = vpop.permute.xlu0 %948  ;;  %v951_v61 = vpop.permute.xlu1 %950 }
 0x24e   :  { %955 = vst.msk [vmem:[#allocation2 + $0x8] sm:$0xfc] %vm954_vm13, %v949_v60 }
 0x24f   :  { %957 = vst.msk [vmem:[#allocation2 + $0x10] sm:$0xf] %vm3415_vm12, %v951_v61  ;;  %vm1028_vm12 = vcmask 654900  }
 0x251   :  { %v824_v21 = vpop.permute.xlu0 %823  ;;  %v826_v2 = vpop.permute.xlu1 %825  ;;  %v1091_v6 = vld [vmem:[#allocation2] sm:$0xff] }
 0x252   :  { %829 = vst.msk [vmem:[#allocation2 + $0x12] sm:$0xfc] %vm809_vm3, %v824_v21  ;;  %2039 = vmatmul.mubr.msk.f32.vlgmr.msra.gmra.mxu1 %vm1114_vm7, %v1091_v6 }
 0x253   :  { %830 = vst.msk [vmem:[#allocation2 + $0x1a] sm:$0xf] %vm3416_vm8, %v826_v2  ;;  %2041 = vmatprep.mubr.msk.f32.mxu1 %vm2112_vm1, %v2111_v1  ;;  %vm919_vm8 = vcmask 406848  }
 0x254   :  { %835 = vst.msk [vmem:[#allocation2 + $0x18] sm:$0xc0] %vm817_vm9, %v826_v2  ;;  %vm1030_vm9 = vcmask 652848  }
 0x255   :  { %875 = vst.msk [vmem:[#allocation2 + $0x10] sm:$0xf0] %vm3417_vm10, %v864_v31  ;;  %v987_v43 = vpop.permute.xlu0 %986  ;;  %v989_v39 = vpop.permute.xlu1 %988  ;;  %vm1069_vm10 = vcmask 736898   ;;  %v3159_v31 = vld [vmem:[%s3400_s4] sm:$0x7f]  ;;  %s2122_s4 = smov 64  }
 0x256   :  { %918 = vst.msk [vmem:[#allocation2 + $0x10] sm:$0xf0] %vm917_vm5, %v907_v46  ;;  %vm1035_vm5 = vcmask 654902   ;;  %v1113_v51 = vrot.slane %v3159_v31, %v1112_v49 }
 0x257   :  { %961 = vst.msk [vmem:[#allocation2 + $0xe] sm:$0xc0] %vm3418_vm0, %v951_v61  ;;  %vm3421_vm0 = vcmask 162896  }
 0x258   :  { %993 = vst.msk [vmem:[#allocation2 + $0xa] sm:$0xff] %vm992_vm2, %v987_v43 }
 0x259   :  { %995 = vst.msk [vmem:[#allocation2 + $0x12] sm:$0x3] %vm3419_vm14, %v989_v39  ;;  %v873_v48 = vpop.permute.xlu0 %872  ;;  %v1026_v47 = vpop.permute.xlu1 %1025  ;;  %vm3422_vm14 = vcmask 490896  }
 0x25a   :  { %1029 = vst.msk [vmem:[#allocation2 + $0x6] sm:$0xf0] %vm1028_vm12, %v1018_v36  ;;  %vm3423_vm12 = vcmask 572900  }
 0x25b   :  { %876 = vst.msk [vmem:[#allocation2 + $0x18] sm:$0x3f] %vm3420_vm11, %v873_v48  ;;  %vm3425_vm11 = vcmask 570848  }
 0x25c   :  { %1031 = vst.msk [vmem:[#allocation2 + $0xe] sm:$0x3f] %vm1030_vm9, %v1026_v47  ;;  %vm3424_vm9 = vcmask 244896  }
 0x25d   :  { %v915_v55 = vpop.permute.xlu0 %914  ;;  %v1064_v59 = vpop.permute.xlu1 %1063 }
 0x25e   :  { %920 = vst.msk [vmem:[#allocation2 + $0x18] sm:$0x3f] %vm919_vm8, %v915_v55  ;;  %vm925_vm8 = vcmask 408902  }
 0x25f   :  { %1070 = vst.msk [vmem:[#allocation2 + $0x8] sm:$0xfc] %vm1069_vm10, %v1064_v59 }
 0x261   :  { %v786_v16 = vpop.permute.xlu0 %785  ;;  %v959_v57 = vpop.permute.xlu1 %958 }
 0x262   :  { %790 = vst.msk [vmem:[#allocation2 + $0x20] sm:$0xff] %vm3421_vm0, %v786_v16  ;;  %vm3426_vm0 = vcmask 326896  }
 0x263   :  { %962 = vst.msk [vmem:[#allocation2 + $0x16] sm:$0xff] %vm3422_vm14, %v959_v57  ;;  %vm1037_vm14 = vcmask 654896  }
 0x264   :  { %999 = vst.msk [vmem:[#allocation2 + $0x10] sm:$0xf0] %vm3423_vm12, %v989_v39  ;;  %vm3429_vm12 = vcmask 162896  }
 0x265   :  { %1036 = vst.msk [vmem:[#allocation2 + $0xe] sm:$0xc0] %vm1035_vm5, %v1026_v47  ;;  %v833_v7 = vpop.permute.xlu0 %832  ;;  %v997_v56 = vpop.permute.xlu1 %996  ;;  %vm3427_vm5 = vcmask 408896  }
 0x266   :  { %v1092_v62 = vld [vmem:[#allocation2 + $0x8] sm:$0xff]  ;;  %836 = vst.msk [vmem:[#allocation2 + $0x20] sm:$0xff] %vm3424_vm9, %v833_v7  ;;  %vm3432_vm9 = vcmask 240800  }
 0x267   :  { %1000 = vst.msk [vmem:[#allocation2 + $0x18] sm:$0x3f] %vm3425_vm11, %v997_v56  ;;  %2042 = vmatmul.mubr.msk.f32.gmra.mxu1 %vm1114_vm7, %v1092_v62  ;;  %vm1071_vm11 = vcmask 732800  }
 0x268   :  { %2044 = vmatprep.mubr.msk.f32.mxu1 %vm2112_vm1, %v2111_v1 }
 0x269   :  { %v880_v35 = vpop.permute.xlu0 %879  ;;  %v882_v15 = vpop.permute.xlu1 %881 }
 0x26a   :  { %885 = vst.msk [vmem:[#allocation2 + $0x1e] sm:$0xff] %vm3426_vm0, %v880_v35  ;;  %vm3434_vm0 = vcmask 324848  }
 0x26b   :  { %886 = vst.msk [vmem:[#allocation2 + $0x26] sm:$0x3] %vm869_vm15, %v882_v15  ;;  %vm3428_vm15 = vcmask 486800  }
 0x26c   :  { %926 = vst.msk [vmem:[#allocation2 + $0x18] sm:$0xc0] %vm925_vm8, %v915_v55  ;;  %vm3433_vm8 = vcmask 566752  }
 0x26d   :  { %v1033_v11 = vpop.permute.xlu0 %1032  ;;  %v923_v50 = vpop.permute.xlu1 %922 }
 0x26e   :  { %1038 = vst.msk [vmem:[#allocation2 + $0x16] sm:$0xff] %vm1037_vm14, %v1033_v11 }
 0x26f   :  { %927 = vst.msk [vmem:[#allocation2 + $0x20] sm:$0xff] %vm3427_vm5, %v923_v50 }
 0x271   :  { %v1066_v17 = vpop.permute.xlu0 %1065  ;;  %v1074_v24 = vpop.permute.xlu1 %1073 }
 0x272   :  { %1072 = vst.msk [vmem:[#allocation2 + $0x10] sm:$0xf] %vm1071_vm11, %v1066_v17 }
 0x273   :  { %1076 = vst.msk [vmem:[#allocation2 + $0xe] sm:$0xc0] %vm1059_vm4, %v1066_v17 }
 0x274   :  { %1077 = vst.msk [vmem:[#allocation2 + $0x16] sm:$0xff] %vm1061_vm6, %v1074_v24 }
 0x275   :  { %v964_v28 = vpop.permute.xlu0 %963  ;;  %v966_v13 = vpop.permute.xlu1 %965 }
 0x276   :  { %969 = vst.msk [vmem:[#allocation2 + $0x1c] sm:$0xfc] %vm954_vm13, %v964_v28  ;;  %vm3430_vm13 = vcmask 156752  }
 0x277   :  { %970 = vst.msk [vmem:[#allocation2 + $0x24] sm:$0xf] %vm3428_vm15, %v966_v13  ;;  %vm3438_vm15 = vcmask 490896  }
 0x279   :  { %v1002_v20 = vpop.permute.xlu0 %1001  ;;  %v1040_v41 = vpop.permute.xlu1 %1039 }
 0x27a   :  { %1007 = vst.msk [vmem:[#allocation2 + $0x1e] sm:$0xff] %vm992_vm2, %v1002_v20  ;;  %vm3431_vm2 = vcmask 326900  }
 0x27b   :  { %v1093_v30 = vld [vmem:[#allocation2 + $0x10] sm:$0xff]  ;;  %1045 = vst.msk [vmem:[#allocation2 + $0x1e] sm:$0xff] %vm1037_vm14, %v1040_v41  ;;  %vm3436_vm14 = vcmask 402752  }
 0x27c   :  { %2045 = vmatmul.mubr.msk.f32.gmra.mxu1 %vm1114_vm7, %v1093_v30 }
 0x27d   :  { %2047 = vmatprep.mubr.msk.f32.mxu1 %vm2112_vm1, %v2111_v1  ;;  %v1079_v42 = vpop.permute.xlu0 %1078  ;;  %v794_v5 = vpop.permute.xlu1 %793 }
 0x27e   :  { %1084 = vst.msk [vmem:[#allocation2 + $0x1c] sm:$0xfc] %vm1069_vm10, %v1079_v42  ;;  %vm1046_vm10 = vcmask 648752  }
 0x27f   :  { %799 = vst.msk [vmem:[#allocation2 + $0x28] sm:$0xff] %vm3429_vm12, %v794_v5  ;;  %vm3439_vm12 = vcmask 572900  }
 0x281   :  { %v796_v33 = vpop.permute.xlu0 %795  ;;  %v840_v9 = vpop.permute.xlu1 %839 }
 0x282   :  { %800 = vst.msk [vmem:[#allocation2 + $0x30] sm:$0x3] %vm3430_vm13, %v796_v33  ;;  %vm3440_vm13 = vcmask 570848  }
 0x283   :  { %845 = vst.msk [vmem:[#allocation2 + $0x26] sm:$0xfc] %vm809_vm3, %v840_v9  ;;  %vm3435_vm3 = vmmov %vm3427_vm5  ;;  %vm3437_vm5 = vcmask 490902  }
 0x284   :  { %891 = vst.msk [vmem:[#allocation2 + $0x24] sm:$0xf0] %vm3431_vm2, %v882_v15  ;;  %vm3441_vm2 = vcmask 654898  }
 0x285   :  { %v842_v34 = vpop.permute.xlu0 %841  ;;  %v1004_v63 = vpop.permute.xlu1 %1003  ;;  %v1094_v10 = vld [vmem:[#allocation2 + $0x18] sm:$0xff] }
 0x286   :  { %846 = vst.msk [vmem:[#allocation2 + $0x2e] sm:$0xf] %vm3432_vm9, %v842_v34  ;;  %2048 = vmatmul.mubr.msk.f32.gmra.mxu1 %vm1114_vm7, %v1094_v10  ;;  %vm3442_vm9 = vcmask 650800  }
 0x287   :  { %1008 = vst.msk [vmem:[#allocation2 + $0x26] sm:$0x3] %vm3433_vm8, %v1004_v63  ;;  %2050 = vmatprep.mubr.msk.f32.mxu1 %vm2112_vm1, %v2111_v1 }
 0x289   :  { %v889_v23 = vpop.permute.xlu0 %888  ;;  %v1042_v8 = vpop.permute.xlu1 %1041 }
 0x28a   :  { %892 = vst.msk [vmem:[#allocation2 + $0x2c] sm:$0x3f] %vm3434_vm0, %v889_v23 }
 0x28b   :  { %1047 = vst.msk [vmem:[#allocation2 + $0x26] sm:$0x3] %vm1046_vm10, %v1042_v8 }
 0x28d   :  { %v931_v4 = vpop.permute.xlu0 %930  ;;  %v933_v44 = vpop.permute.xlu1 %932 }
 0x28e   :  { %936 = vst.msk [vmem:[#allocation2 + $0x28] sm:$0xff] %vm3435_vm3, %v931_v4 }
 0x28f   :  { %937 = vst.msk [vmem:[#allocation2 + $0x30] sm:$0x3] %vm3436_vm14, %v933_v44 }
 0x290   :  { %974 = vst.msk [vmem:[#allocation2 + $0x22] sm:$0xc0] %vm3437_vm5, %v966_v13 }
 0x291   :  { %v1081_v58 = vpop.permute.xlu0 %1080  ;;  %v972_v3 = vpop.permute.xlu1 %971 }
 0x292   :  { %1085 = vst.msk [vmem:[#allocation2 + $0x24] sm:$0xf] %vm1071_vm11, %v1081_v58  ;;  %vm3443_vm11 = vcmask 80896  }
 0x293   :  { %975 = vst.msk [vmem:[#allocation2 + $0x2a] sm:$0xff] %vm3438_vm15, %v972_v3  ;;  %vm3444_vm10 = vmmov %vm3443_vm11 }
 0x294   :  { %1013 = vst.msk [vmem:[#allocation2 + $0x24] sm:$0xf0] %vm3439_vm12, %v1004_v63  ;;  %vm3445_vm0 = vmmov %vm3444_vm10 }
 0x295   :  { %v1011_v29 = vpop.permute.xlu0 %1010  ;;  %v1049_v12 = vpop.permute.xlu1 %1048  ;;  %vm3446_vm3 = vmmov %vm3445_vm0 }
 0x296   :  { %1014 = vst.msk [vmem:[#allocation2 + $0x2c] sm:$0x3f] %vm3440_vm13, %v1011_v29  ;;  %vm3447_vm5 = vmmov %vm3445_vm0  ;;  %vm3449_vm13 = vcmask 74752  }
 0x297   :  { %1051 = vst.msk [vmem:[#allocation2 + $0x26] sm:$0xfc] %vm3441_vm2, %v1042_v8  ;;  %vm3448_vm15 = vmmov %vm3445_vm0 }
 0x298   :  { %1052 = vst.msk [vmem:[#allocation2 + $0x2e] sm:$0xf] %vm3442_vm9, %v1049_v12  ;;  %vm3450_vm2 = vmmov %vm3445_vm0 }
 0x299   :  { %1089 = vst.msk [vmem:[#allocation2 + $0x22] sm:$0xc0] %vm1059_vm4, %v1081_v58  ;;  %v1087_v18 = vpop.permute.xlu0 %1086  ;;  %v1095_v19 = vld [vmem:[#allocation2 + $0x20] sm:$0xff]  ;;  %vm3451_vm9 = vmmov %vm3445_vm0 }
 0x29a   :  { %1090 = vst.msk [vmem:[#allocation2 + $0x2a] sm:$0xff] %vm1061_vm6, %v1087_v18  ;;  %2051 = vmatmul.mubr.msk.f32.gmra.mxu1 %vm1114_vm7, %v1095_v19 }
 0x29b   :  { %2053 = vmatprep.mubr.msk.f32.mxu1 %vm2112_vm1, %v2111_v1 }
 0x2a1   :  { %v1096_v38 = vld [vmem:[#allocation2 + $0x28] sm:$0xff]  ;;  %v1097_v45 = vld [vmem:[#allocation2 + $0x30] sm:$0x3] }
 0x2a2   :  { %2054 = vmatmul.mubr.msk.f32.gmra.mxu1 %vm1114_vm7, %v1096_v38 }
 0x2a3   :  { %2056 = vmatprep.mubr.msk.f32.mxu1 %vm2112_vm1, %v2111_v1 }
 0x2a6   :  { %2057 = vmatmul.mubr.msk.f32.gmra.mxu1 %vm1114_vm7, %v1097_v45 }
 0x312   :  { %v1206_v53 = vpop.f32.mrf.mxu1 }
 0x313   :  { %v1207_v46 = vadd.f32 %v1206_v53, %v1113_v51 }
 0x314   :  { %v2040_v22 = vpop.f32.mrf.mxu1 }
 0x315   :  { %v1247_v61 = vmul.f32 0.02, %v1207_v46  ;;  %vm1240_vm6 = vcmp.ge.f32.partialorder %v1207_v46, 0.0 }
 0x317   :  { %v1254_v48 = vsel %vm1240_vm6, %v1207_v46, %v1247_v61  ;;  %vm3453_vm6 = vmmov %vm3445_vm0 }
 0x318   :  { %v1261_v57 = vsel %vm3444_vm10, %v1254_v48, 0.0 }
 0x327   :  { %v1211_v26 = vpop.f32.mrf.mxu1 }
 0x328   :  { %v1212_v36 = vadd.f32 %v1211_v26, %v1113_v51 }
 0x329   :  { %v2043_v27 = vpop.f32.mrf.mxu1 }
 0x32a   :  { %v1248_v54 = vmul.f32 0.02, %v1212_v36  ;;  %vm1241_vm1 = vcmp.ge.f32.partialorder %v1212_v36, 0.0 }
 0x32c   :  { %v1255_v43 = vsel %vm1241_vm1, %v1212_v36, %v1248_v54  ;;  %vm3452_vm1 = vmmov %vm3445_vm0 }
 0x32d   :  { %v1262_v59 = vsel %vm3443_vm11, %v1255_v43, 0.0  ;;  %vm3456_vm11 = vmmov %vm3449_vm13 }
 0x32e   :  { %v1263_v62 = vadd.f32 %v1262_v59, %v1261_v57 }
 0x33c   :  { %v1216_v32 = vpop.f32.mrf.mxu1 }
 0x33d   :  { %v1217_v40 = vadd.f32 %v1216_v32, %v1113_v51 }
 0x33e   :  { %v2046_v52 = vpop.f32.mrf.mxu1 }
 0x33f   :  { %v1249_v21 = vmul.f32 0.02, %v1217_v40  ;;  %vm1242_vm4 = vcmp.ge.f32.partialorder %v1217_v40, 0.0 }
 0x341   :  { %v1256_v47 = vsel %vm1242_vm4, %v1217_v40, %v1249_v21  ;;  %vm3454_vm4 = vmmov %vm3445_vm0 }
 0x342   :  { %v1264_v7 = vsel %vm3445_vm0, %v1256_v47, 0.0 }
 0x343   :  { %v1265_v17 = vadd.f32 %v1264_v7, %v1263_v62 }
 0x346   :  { %v1221_v14 = vpop.f32.mrf.mxu1 }
 0x347   :  { %v1222_v37 = vadd.f32 %v1221_v14, %v1113_v51 }
 0x348   :  { %v2049_v25 = vpop.f32.mrf.mxu1 }
 0x349   :  { %v1250_v39 = vmul.f32 0.02, %v1222_v37  ;;  %vm1243_vm7 = vcmp.ge.f32.partialorder %v1222_v37, 0.0 }
 0x34b   :  { %v1257_v16 = vsel %vm1243_vm7, %v1222_v37, %v1250_v39  ;;  %vm3455_vm7 = vmmov %vm3445_vm0 }
 0x34c   :  { %v1266_v11 = vsel %vm3446_vm3, %v1257_v16, 0.0 }
 0x34d   :  { %v1267_v20 = vadd.f32 %v1266_v11, %v1265_v17  ;;  %v1321_v11 = vsub.s32 4, %v2370_v0 }
 0x35a   :  { %v1226_v60 = vpop.f32.mrf.mxu1 }
 0x35b   :  { %v1227_v2 = vadd.f32 %v1226_v60, %v1113_v51 }
 0x35c   :  { %v2052_v6 = vpop.f32.mrf.mxu1 }
 0x35d   :  { %v1251_v55 = vmul.f32 0.02, %v1227_v2  ;;  %vm1244_vm8 = vcmp.ge.f32.partialorder %v1227_v2, 0.0 }
 0x35f   :  { %v1258_v35 = vsel %vm1244_vm8, %v1227_v2, %v1251_v55  ;;  %vm3457_vm8 = vmmov %vm3456_vm11 }
 0x360   :  { %v1268_v28 = vsel %vm3447_vm5, %v1258_v35, 0.0  ;;  %vm3458_vm10 = vmmov %vm3457_vm8  ;;  %vm1374_vm5 = vcmask 337152  }
 0x361   :  { %v1269_v33 = vadd.f32 %v1268_v28, %v1267_v20  ;;  %vm3459_vm0 = vmmov %vm3457_vm8 }
 0x362   :  { %v1231_v56 = vpop.f32.mrf.mxu1  ;;  %vm3460_vm3 = vmmov %vm3459_vm0 }
 0x363   :  { %v1232_v15 = vadd.f32 %v1231_v56, %v1113_v51 }
 0x364   :  { %v2055_v50 = vpop.f32.mrf.mxu1 }
 0x365   :  { %vm1245_vm14 = vcmp.ge.f32.partialorder %v1232_v15, 0.0  ;;  %v1252_v24 = vmul.f32 0.02, %v1232_v15  ;;  %v1332_v50 = vsub.s32 5, %v2370_v0 }
 0x366   :  { %v1236_v13 = vpop.f32.mrf.mxu1 }
 0x367   :  { %v1259_v41 = vsel %vm1245_vm14, %v1232_v15, %v1252_v24  ;;  %v1237_v30 = vadd.f32 %v1236_v13, %v1113_v51  ;;  %v1333_v20 = vrot.slane %v3159_v31, %v1332_v50  ;;  %vm1361_vm14 = vcmask 205952  }
 0x368   :  { %v1270_v42 = vsel %vm3448_vm15, %v1259_v41, 0.0  ;;  %v2058_v5 = vpop.f32.mrf.mxu1  ;;  %vm1380_vm15 = vcmask 468352  }
 0x369   :  { %vm1246_vm12 = vcmp.ge.f32.partialorder %v1237_v30, 0.0  ;;  %v1253_v9 = vmul.f32 0.02, %v1237_v30  ;;  %v1271_v34 = vadd.f32 %v1270_v42, %v1269_v33 }
 0x36b   :  { %v1260_v63 = vsel %vm1246_vm12, %v1237_v30, %v1253_v9  ;;  %vm1393_vm12 = vcmask 599552  }
 0x36c   :  { %v1272_v10 = vsel %vm3449_vm13, %v1260_v63, 0.0  ;;  %vm1399_vm13 = vcmask 730752  }
 0x36d   :  { %v1273_v23 = vadd.f32 %v1272_v10, %v1271_v34 }
 0x36f   :  { %v1274_v8 = vrot.slane %v1273_v23, 4 }
 0x371   :  { %v1275_v4 = vadd.f32 %v1274_v8, %v1273_v23 }
 0x373   :  { %v1276_v44 = vrot.slane %v1275_v4, 2 }
 0x375   :  { %v1277_v58 = vadd.f32 %v1276_v44, %v1275_v4 }
 0x377   :  { %v1278_v3 = vrot.slane %v1277_v58, 1 }
 0x379   :  { %v1279_v29 = vadd.f32 %v1278_v3, %v1277_v58 }
 0x37b   :  { %v1281_v12 = vmul.f32 0.02, %v1279_v29 }
 0x37d   :  { %v1282_v18 = vsub.f32 %v1254_v48, %v1281_v12  ;;  %v1283_v19 = vsub.f32 %v1255_v43, %v1281_v12  ;;  %v1284_v38 = vsub.f32 %v1256_v47, %v1281_v12  ;;  %v1285_v45 = vsub.f32 %v1257_v16, %v1281_v12 }
 0x37e   :  { %v1286_v53 = vsub.f32 %v1258_v35, %v1281_v12  ;;  %v1287_v32 = vsub.f32 %v1259_v41, %v1281_v12  ;;  %v1288_v51 = vsub.f32 %v1260_v63, %v1281_v12  ;;  %v2121_v35 = vmov 1983009808  }
 0x37f   :  { %v1289_v22 = vmul.f32 %v1282_v18, %v1282_v18  ;;  %v1290_v26 = vmul.f32 %v1283_v19, %v1283_v19  ;;  %v1291_v27 = vmul.f32 %v1284_v38, %v1284_v38  ;;  %v1292_v52 = vmul.f32 %v1285_v45, %v1285_v45 }
 0x380   :  { %v1293_v36 = vmul.f32 %v1286_v53, %v1286_v53  ;;  %v1294_v54 = vmul.f32 %v1287_v32, %v1287_v32  ;;  %v1295_v61 = vmul.f32 %v1288_v51, %v1288_v51  ;;  %v1351_v15 = vunpack.c.l.s4 %v2121_v35  ;;  %v1576_v35 = vld [vmem:[%s3399_s3 + $0xc0] sm:$0xff] }
 0x381   :  { %v1296_v14 = vsel %vm3450_vm2, %v1289_v22, 0.0  ;;  %v1297_v25 = vsel %vm3451_vm9, %v1290_v26, 0.0  ;;  %v1299_v46 = vsel %vm3452_vm1, %v1291_v27, 0.0  ;;  %v1301_v37 = vsel %vm3453_vm6, %v1292_v52, 0.0  ;;  %v1583_v52 = vld [vmem:[%s3399_s3 + $0xf8] sm:$0xff]  ;;  %vm3461_vm6 = vmmov %vm3459_vm0 }
 0x382   :  { %v1298_v49 = vadd.f32 %v1297_v25, %v1296_v14  ;;  %v1303_v21 = vsel %vm3454_vm4, %v1293_v36, 0.0  ;;  %v1305_v6 = vsel %vm3455_vm7, %v1294_v54, 0.0  ;;  %v1307_v39 = vsel %vm3456_vm11, %v1295_v61, 0.0  ;;  %v1567_v14 = vld [vmem:[%s3399_s3 + $0x78] sm:$0xff]  ;;  %1882 = vmatprep.subr.mxu1 %v1583_v52  ;;  %v1582_v25 = vld [vmem:[%s3399_s3 + $0xf0] sm:$0xff]  ;;  %v1565_v54 = vld [vmem:[%s3399_s3 + $0x68] sm:$0xff] }
 0x383   :  { %v1352_v24 = vunpack.c.0.s8 %v1351_v15  ;;  %1883 = vmatpush3.msra.mxu1 %v1567_v14  ;;  %v1560_v15 = vld [vmem:[%s3399_s3 + $0x40] sm:$0xff]  ;;  %vm1412_vm2 = vcmask 861952   ;;  %vm1418_vm9 = vcmask 993152   ;;  %vm1627_vm1 = vcmask 130048  }
 0x384   :  { %v1300_v40 = vadd.f32 %v1299_v46, %v1298_v49  ;;  %v1566_v49 = vld [vmem:[%s3399_s3 + $0x70] sm:$0xff]  ;;  %1884 = vmatprep.subr.mxu1 %v1582_v25 }
 0x385   :  { %v3181_v41 = vsub.s32 %v1352_v24, %v2370_v0  ;;  %1885 = vmatpush3.msra.mxu1 %v1566_v49  ;;  %v1559_v24 = vld [vmem:[%s3399_s3 + $0x38] sm:$0xff] }
 0x386   :  { %v1302_v60 = vadd.f32 %v1301_v37, %v1300_v40  ;;  %v1581_v40 = vld [vmem:[%s3399_s3 + $0xe8] sm:$0xff]  ;;  %v1580_v37 = vld [vmem:[%s3399_s3 + $0xe0] sm:$0xff] }
 0x387   :  { %1886 = vmatprep.subr.mxu1 %v1581_v40 }
 0x388   :  { %v1304_v2 = vadd.f32 %v1303_v21, %v1302_v60  ;;  %1887 = vmatpush3.msra.mxu1 %v1565_v54  ;;  %v1564_v21 = vld [vmem:[%s3399_s3 + $0x60] sm:$0xff] }
 0x389   :  { %1888 = vmatprep.subr.mxu1 %v1580_v37 }
 0x38a   :  { %v1306_v43 = vadd.f32 %v1305_v6, %v1304_v2  ;;  %v1579_v2 = vld [vmem:[%s3399_s3 + $0xd8] sm:$0xff]  ;;  %1889 = vmatpush3.msra.mxu1 %v1564_v21 }
 0x38b   :  { %v1563_v6 = vld [vmem:[%s3399_s3 + $0x58] sm:$0xff]  ;;  %1890 = vmatprep.subr.mxu1 %v1579_v2 }
 0x38c   :  { %v1308_v48 = vadd.f32 %v1307_v39, %v1306_v43  ;;  %1891 = vmatpush3.msra.mxu1 %v1563_v6 }
 0x38e   :  { %v1309_v47 = vrot.slane %v1308_v48, 4 }
 0x390   :  { %v1310_v55 = vadd.f32 %v1309_v47, %v1308_v48 }
 0x392   :  { %v1311_v59 = vrot.slane %v1310_v55, 2 }
 0x394   :  { %v1312_v16 = vadd.f32 %v1311_v59, %v1310_v55  ;;  %v1578_v55 = vld [vmem:[%s3399_s3 + $0xd0] sm:$0xff] }
 0x395   :  { %v1562_v59 = vld [vmem:[%s3399_s3 + $0x50] sm:$0xff]  ;;  %1892 = vmatprep.subr.mxu1 %v1578_v55 }
 0x396   :  { %v1313_v57 = vrot.slane %v1312_v16, 1  ;;  %1893 = vmatpush3.msra.mxu1 %v1562_v59  ;;  %v1598_v55 = vld [vmem:[%s3399_s3 + $0x170] sm:$0xff]  ;;  %v1596_v59 = vld [vmem:[%s3399_s3 + $0x160] sm:$0xff] }
 0x398   :  { %v1314_v7 = vadd.f32 %v1313_v57, %v1312_v16  ;;  %v1577_v16 = vld [vmem:[%s3399_s3 + $0xc8] sm:$0xff] }
 0x399   :  { %1894 = vmatprep.subr.mxu1 %v1577_v16  ;;  %v1595_v16 = vld [vmem:[%s3399_s3 + $0x158] sm:$0xff] }
 0x39a   :  { %v1315_v56 = vmul.f32 0.02, %v1314_v7 }
 0x39c   :  { %v1316_v62 = vadd.f32 1e-05, %v1315_v56 }
 0x39e   :  { %2084 = vrsqrt.f32 %v1316_v62  ;;  %v1561_v62 = vld [vmem:[%s3399_s3 + $0x48] sm:$0xff] }
 0x39f   :  { %1895 = vmatpush3.msra.mxu1 %v1561_v62  ;;  %v1591_v62 = vld [vmem:[%s3399_s3 + $0x138] sm:$0xff] }
 0x3a0   :  { %1896 = vmatprep.subr.mxu1 %v1576_v35  ;;  %v1590_v35 = vld [vmem:[%s3399_s3 + $0x130] sm:$0xff] }
 0x3a1   :  { %1897 = vmatpush3.msra.mxu1 %v1560_v15  ;;  %v1589_v15 = vld [vmem:[%s3399_s3 + $0x128] sm:$0xff] }
 0x3ab   :  { %v2085_v17 = vpop.eup %2084 }
 0x3ac   :  { %v1318_v28 = vmul.f32 %v3159_v31, %v2085_v17  ;;  %v1575_v17 = vld [vmem:[%s3399_s3 + $0xb8] sm:$0xff] }
 0x3ad   :  { %1898 = vmatprep.subr.mxu1 %v1575_v17  ;;  %v1586_v17 = vld [vmem:[%s3399_s3 + $0x110] sm:$0xff] }
 0x3ae   :  { %v1322_v13 = vrot.slane %v1318_v28, %v1321_v11  ;;  %v1574_v28 = vld [vmem:[%s3399_s3 + $0xb0] sm:$0xff]  ;;  %1899 = vmatpush3.msra.mxu1 %v1559_v24  ;;  %v1585_v24 = vld [vmem:[%s3399_s3 + $0x108] sm:$0xff] }
 0x3af   :  { %1900 = vmatprep.subr.mxu1 %v1574_v28  ;;  %v1584_v28 = vld [vmem:[%s3399_s3 + $0x100] sm:$0xff] }
 0x3b0   :  { %v1329_v30 = vmul.f32 %v1322_v13, %v1288_v51  ;;  %v1326_v42 = vmul.f32 %v1322_v13, %v1285_v45  ;;  %v1324_v5 = vmul.f32 %v1322_v13, %v1283_v19  ;;  %v1328_v33 = vmul.f32 %v1322_v13, %v1287_v32 }
 0x3b1   :  { %v1323_v9 = vmul.f32 %v1322_v13, %v1282_v18  ;;  %v1325_v34 = vmul.f32 %v1322_v13, %v1284_v38  ;;  %v1327_v63 = vmul.f32 %v1322_v13, %v1286_v53 }
 0x3b2   :  { %v1340_v10 = vadd.f32 %v1333_v20, %v1329_v30  ;;  %v3183_v23 = vadd.f32 %v1333_v20, %v1326_v42  ;;  %v3185_v8 = vadd.f32 %v1333_v20, %v1324_v5  ;;  %v3192_v12 = vadd.f32 %v1333_v20, %v1328_v33  ;;  %v1558_v30 = vld [vmem:[%s3399_s3 + $0x30] sm:$0xff]  ;;  %v1573_v42 = vld [vmem:[%s3399_s3 + $0xa8] sm:$0xff] }
 0x3b3   :  { %v1334_v4 = vadd.f32 %v1333_v20, %v1323_v9  ;;  %v1336_v44 = vadd.f32 %v1333_v20, %v1325_v34  ;;  %v1338_v58 = vadd.f32 %v1333_v20, %v1327_v63  ;;  %v1557_v5 = vld [vmem:[%s3399_s3 + $0x28] sm:$0xff]  ;;  %1901 = vmatpush3.msra.mxu1 %v1558_v30  ;;  %v1572_v34 = vld [vmem:[%s3399_s3 + $0xa0] sm:$0xff] }
 0x3b4   :  { %1550 = vst.msk [vmem:[#allocation3 + $0x6] sm:$0x3] %vm3457_vm8, %v1340_v10  ;;  %v1458_v3 = vrot.slane %v3183_v23, %v3181_v41  ;;  %v1389_v29 = vrot.slane %v3185_v8, %v3181_v41  ;;  %v1523_v19 = vrot.slane %v3192_v12, %v3181_v41  ;;  %v1401_v48 = vcombine.high %v3185_v8, %v3185_v8  ;;  %v1556_v63 = vld [vmem:[%s3399_s3 + $0x20] sm:$0xff]  ;;  %v1571_v10 = vld [vmem:[%s3399_s3 + $0x98] sm:$0xff] }
 0x3b5   :  { %v1356_v18 = vrot.slane %v1334_v4, %v3181_v41  ;;  %1348 = vst.msk [vmem:[#allocation3] sm:$0x3] %vm3458_vm10, %v1334_v4  ;;  %v1428_v45 = vrot.slane %v1336_v44, %v3181_v41  ;;  %v1493_v53 = vrot.slane %v1338_v58, %v3181_v41  ;;  %v1363_v27 = vcombine.high %v1334_v4, %v1334_v4  ;;  %v1570_v4 = vld [vmem:[%s3399_s3 + $0x90] sm:$0xff] }
 0x3b6   :  { %1420 = vst.msk [vmem:[#allocation3 + $0x2] sm:$0x3] %vm3459_vm0, %v1336_v44  ;;  %1459 = vrot.lane.b32.xlu1 %v1458_v3, %s2122_s4  ;;  %1390 = vrot.lane.b32.xlu0 %v1389_v29, %s2122_s4  ;;  %v1434_v32 = vcombine.high %v1336_v44, %v1336_v44  ;;  %v1499_v46 = vcombine.high %v1338_v58, %v1338_v58  ;;  %v1554_v44 = vld [vmem:[%s3399_s3 + $0x10] sm:$0xff] }
 0x3b7   :  { %1485 = vst.msk [vmem:[#allocation3 + $0x4] sm:$0x3] %vm3460_vm3, %v1338_v58  ;;  %v1357_v38 = vcombine.high %v1356_v18, %v1356_v18  ;;  %v1429_v22 = vcombine.high %v1428_v45, %v1428_v45  ;;  %v1494_v26 = vcombine.high %v1493_v53, %v1493_v53  ;;  %v1370_v51 = vrot.slane %v1363_v27, %v3181_v41  ;;  %v1569_v58 = vld [vmem:[%s3399_s3 + $0x88] sm:$0xff] }
 0x3b8   :  { %v1441_v36 = vrot.slane %v1434_v32, %v3181_v41  ;;  %v1506_v60 = vrot.slane %v1499_v46, %v3181_v41  ;;  %v1395_v61 = vcombine.high %v1389_v29, %v1389_v29  ;;  %v1463_v43 = vcombine.high %v1458_v3, %v1458_v3  ;;  %1902 = vmatprep.subr.mxu1 %v1573_v42  ;;  %v1553_v3 = vld [vmem:[%s3399_s3 + $0x8] sm:$0xff]  ;;  %v1568_v29 = vld [vmem:[%s3399_s3 + $0x80] sm:$0xff] }
 0x3b9   :  { %v1528_v39 = vcombine.high %v1523_v19, %v1523_v19  ;;  %v1468_v47 = vcombine.high %v3183_v23, %v3183_v23  ;;  %v1408_v57 = vrot.slane %v1401_v48, %v3181_v41  ;;  %v1533_v56 = vcombine.high %v3192_v12, %v3192_v12  ;;  %1903 = vmatpush3.msra.mxu1 %v1557_v5  ;;  %v1555_v23 = vld [vmem:[%s3399_s3 + $0x18] sm:$0xff]  ;;  %v1552_v12 = vld [vmem:[%s3399_s3] sm:$0xff] }
 0x3ba   :  { %1524 = vrot.lane.b32.xlu0 %v1523_v19, %s2122_s4  ;;  %1358 = vrot.lane.b32.xlu1 %v1357_v38, %s2123_s8  ;;  %v1376_v50 = vcombine.high %v1370_v51, %v1370_v51  ;;  %v1446_v13 = vcombine.high %v1441_v36, %v1441_v36  ;;  %v1511_v20 = vcombine.high %v1506_v60, %v1506_v60  ;;  %v1599_v48 = vld [vmem:[%s3399_s3 + $0x178] sm:$0xff]  ;;  %v1604_v42 = vsub.s32 6, %v2370_v0 }
 0x3bb   :  { %v1475_v7 = vrot.slane %v1468_v47, %v3181_v41  ;;  %v1540_v11 = vrot.slane %v1533_v56, %v3181_v41  ;;  %v1414_v9 = vcombine.high %v1408_v57, %v1408_v57  ;;  %1904 = vmatprep.subr.mxu1 %v1572_v34  ;;  %v1592_v56 = vld [vmem:[%s3399_s3 + $0x140] sm:$0xff] }
 0x3bc   :  { %1905 = vmatpush3.msra.mxu1 %v1556_v63 }
 0x3bd   :  { %v1480_v33 = vcombine.high %v1475_v7, %v1475_v7  ;;  %v1545_v8 = vcombine.high %v1540_v11, %v1540_v11  ;;  %1906 = vmatprep.subr.mxu1 %v1571_v10 }
 0x3be   :  { %1430 = vrot.lane.b32.xlu0 %v1429_v22, %s2123_s8  ;;  %1495 = vrot.lane.b32.xlu1 %v1494_v26, %s2123_s8 }
 0x3bf   :  { %1907 = vmatpush3.msra.mxu1 %v1555_v23 }
 0x3c0   :  { %1908 = vmatprep.subr.mxu1 %v1570_v4 }
 0x3c1   :  { %1909 = vmatpush3.msra.mxu1 %v1554_v44 }
 0x3c2   :  { %1371 = vrot.lane.b32.xlu0 %v1370_v51, %s2124_s25  ;;  %1442 = vrot.lane.b32.xlu1 %v1441_v36, %s2124_s25 }
 0x3c3   :  { %1910 = vmatprep.subr.mxu1 %v1569_v58 }
 0x3c4   :  { %1911 = vmatpush3.msra.mxu1 %v1553_v3 }
 0x3c5   :  { %1912 = vmatprep.subr.mxu1 %v1568_v29 }
 0x3c6   :  { %1507 = vrot.lane.b32.xlu0 %v1506_v60, %s2124_s25  ;;  %1396 = vrot.lane.b32.xlu1 %v1395_v61, %s2120_s10 }
 0x3c7   :  { %1913 = vmatpush3.msra.mxu1 %v1552_v12 }
 0x3c8   :  { %1700 = vmatprep.subr.mxu1 %v2111_v1 }
 0x3ca   :  { %1464 = vrot.lane.b32.xlu0 %v1463_v43, %s2120_s10  ;;  %1529 = vrot.lane.b32.xlu1 %v1528_v39, %s2120_s10 }
 0x3ce   :  { %1409 = vrot.lane.b32.xlu0 %v1408_v57, %s2125_s15  ;;  %1476 = vrot.lane.b32.xlu1 %v1475_v7, %s2125_s15  ;;  %v1594_v57 = vld [vmem:[%s3399_s3 + $0x150] sm:$0xff]  ;;  %v1593_v7 = vld [vmem:[%s3399_s3 + $0x148] sm:$0xff] }
 0x3d2   :  { %1541 = vrot.lane.b32.xlu0 %v1540_v11, %s2125_s15  ;;  %1377 = vrot.lane.b32.xlu1 %v1376_v50, %s2126_s23  ;;  %v1588_v11 = vld [vmem:[%s3399_s3 + $0x120] sm:$0xff]  ;;  %v1587_v50 = vld [vmem:[%s3399_s3 + $0x118] sm:$0xff] }
 0x3d6   :  { %1447 = vrot.lane.b32.xlu0 %v1446_v13, %s2126_s23  ;;  %1512 = vrot.lane.b32.xlu1 %v1511_v20, %s2126_s23  ;;  %v1601_v13 = vld [vmem:[%s3399_s3 + $0x188] sm:$0xff]  ;;  %v1600_v20 = vld [vmem:[%s3399_s3 + $0x180] sm:$0xff] }
 0x3da   :  { %1481 = vrot.lane.b32.xlu0 %v1480_v33, %s2127_s14  ;;  %1415 = vrot.lane.b32.xlu1 %v1414_v9, %s2127_s14  ;;  %v1605_v9 = vrot.slane %v3159_v31, %v1604_v42 }
 0x3de   :  { %1546 = vrot.lane.b32.xlu1 %v1545_v8, %s2127_s14 }
 0x428   :  { %v1460_v18 = vpop.permute.xlu1 %1459  ;;  %v1391_v19 = vpop.permute.xlu0 %1390 }
 0x42c   :  { %v1525_v38 = vpop.permute.xlu0 %1524  ;;  %v1359_v45 = vpop.permute.xlu1 %1358 }
 0x42d   :  { %1362 = vst.msk [vmem:[#allocation3] sm:$0x3] %vm1361_vm14, %v1359_v45 }
 0x430   :  { %v1431_v53 = vpop.permute.xlu0 %1430  ;;  %v1496_v22 = vpop.permute.xlu1 %1495 }
 0x431   :  { %1433 = vst.msk [vmem:[#allocation3 + $0x2] sm:$0x3] %vm1361_vm14, %v1431_v53  ;;  %1498 = vst.msk [vmem:[#allocation3 + $0x4] sm:$0x3] %vm1361_vm14, %v1496_v22 }
 0x434   :  { %v1372_v26 = vpop.permute.xlu0 %1371  ;;  %v1443_v27 = vpop.permute.xlu1 %1442 }
 0x435   :  { %1375 = vst.msk [vmem:[#allocation3] sm:$0x3] %vm1374_vm5, %v1372_v26  ;;  %1445 = vst.msk [vmem:[#allocation3 + $0x2] sm:$0x3] %vm1374_vm5, %v1443_v27 }
 0x438   :  { %v1508_v32 = vpop.permute.xlu0 %1507  ;;  %v1397_v52 = vpop.permute.xlu1 %1396 }
 0x439   :  { %1510 = vst.msk [vmem:[#allocation3 + $0x4] sm:$0x3] %vm1374_vm5, %v1508_v32 }
 0x43c   :  { %v1465_v14 = vpop.permute.xlu0 %1464  ;;  %v1530_v25 = vpop.permute.xlu1 %1529 }
 0x440   :  { %v1410_v49 = vpop.permute.xlu0 %1409  ;;  %v1477_v51 = vpop.permute.xlu1 %1476 }
 0x444   :  { %v1542_v36 = vpop.permute.xlu0 %1541  ;;  %v1378_v46 = vpop.permute.xlu1 %1377 }
 0x445   :  { %1381 = vst.msk [vmem:[#allocation3] sm:$0x3] %vm1380_vm15, %v1378_v46 }
 0x446   :  { %1394 = vst.msk [vmem:[#allocation3] sm:$0x3] %vm1393_vm12, %v1391_v19 }
 0x447   :  { %1400 = vst.msk [vmem:[#allocation3] sm:$0x3] %vm1399_vm13, %v1397_v52 }
 0x448   :  { %v1448_v40 = vpop.permute.xlu0 %1447  ;;  %v1513_v54 = vpop.permute.xlu1 %1512  ;;  %1413 = vst.msk [vmem:[#allocation3] sm:$0x3] %vm1412_vm2, %v1410_v49 }
 0x449   :  { %1450 = vst.msk [vmem:[#allocation3 + $0x2] sm:$0x3] %vm1380_vm15, %v1448_v40  ;;  %1515 = vst.msk [vmem:[#allocation3 + $0x4] sm:$0x3] %vm1380_vm15, %v1513_v54 }
 0x44a   :  { %1462 = vst.msk [vmem:[#allocation3 + $0x2] sm:$0x3] %vm1393_vm12, %v1460_v18  ;;  %1527 = vst.msk [vmem:[#allocation3 + $0x4] sm:$0x3] %vm1393_vm12, %v1525_v38 }
 0x44b   :  { %1467 = vst.msk [vmem:[#allocation3 + $0x2] sm:$0x3] %vm1399_vm13, %v1465_v14  ;;  %1532 = vst.msk [vmem:[#allocation3 + $0x4] sm:$0x3] %vm1399_vm13, %v1530_v25 }
 0x44c   :  { %v1482_v37 = vpop.permute.xlu0 %1481  ;;  %1479 = vst.msk [vmem:[#allocation3 + $0x2] sm:$0x3] %vm1412_vm2, %v1477_v51  ;;  %v1416_v60 = vpop.permute.xlu1 %1415  ;;  %1544 = vst.msk [vmem:[#allocation3 + $0x4] sm:$0x3] %vm1412_vm2, %v1542_v36 }
 0x44d   :  { %1484 = vst.msk [vmem:[#allocation3 + $0x2] sm:$0x3] %vm1418_vm9, %v1482_v37  ;;  %1419 = vst.msk [vmem:[#allocation3] sm:$0x3] %vm1418_vm9, %v1416_v60 }
 0x450   :  { %v1547_v61 = vpop.permute.xlu1 %1546 }
 0x451   :  { %1549 = vst.msk [vmem:[#allocation3 + $0x4] sm:$0x3] %vm1418_vm9, %v1547_v61 }
 0x458   :  { %v1551_v21 = vld [vmem:[#allocation3] sm:$0xff] }
 0x459   :  { %v1607_v2 = vcombine.high %v1551_v21, %v1551_v21  ;;  %v1614_v6 = vrot.slane %v1551_v21, %v3181_v41 }
 0x45b   :  { %v1622_v43 = vcombine.high %v1614_v6, %v1614_v6  ;;  %v1621_v39 = vrot.slane %v1607_v2, %v3181_v41  ;;  %v1597_v41 = vld [vmem:[%s3399_s3 + $0x168] sm:$0xff]  ;;  %s2128_s3 = smov [#allocation4]  }
 0x45c   :  { %s1781_s30 = sshll.u32 %s2128_s3, 4  ;;  %s1782_s30 = int_to_ptr.vmem [resolvable:$true] %s1781_s30 }
 0x45d   :  { %1694 = vmatprep.mubr.f32.mxu1 %v1622_v43  ;;  %v1623_v47 = vcombine.high %v1621_v39, %v1621_v39  ;;  %s2089_s0 = scalar_lea.vmem %s1782_s30, 32  ;;  %p2094_p1 = scmp.lt.s32.totalorder %s1782_s30, %s1782_s30 }
 0x45e   :  { %1695 = vmatmul.mubr.f32.vlgmr.msra.gmra.mxu1 %v1614_v6  ;;  %p2090_p0 = scmp.ne.s32.totalorder %s1782_s30, %s2089_s0  ;;  %p2095_p2 = scmp.lt.s32.totalorder %s2089_s0, %s2089_s0 }
 0x45f   :  { %1701 = vmatpush1.msra.mxu1 %v1599_v48  ;;  %1829 = vmatprep.mubr.msk.f32.mxu1 %vm1627_vm1, %v1623_v47 }
 0x460   :  { %1702 = vmatprep.subr.mxu1 %v2111_v1  ;;  %p2096_p3 = por %p2095_p2, %p2094_p1 }
 0x461   :  { %1703 = vmatpush1.msra.mxu1 %v1598_v55 }
 0x462   :  { %1704 = vmatprep.subr.mxu1 %v2111_v1  ;;  %p2097_p4 = pnand %p2096_p3, %p2090_p0 }
 0x463   :  { %1705 = vmatpush1.msra.mxu1 %v1597_v41 }
 0x464   :  { %1706 = vmatprep.subr.mxu1 %v2111_v1 }
 0x465   :  { %1707 = vmatpush1.msra.mxu1 %v1596_v59 }
 0x466   :  { %1708 = vmatprep.subr.mxu1 %v2111_v1 }
 0x467   :  { %1709 = vmatpush1.msra.mxu1 %v1595_v16 }
 0x468   :  { %1710 = vmatprep.subr.mxu1 %v2111_v1 }
 0x469   :  { %1711 = vmatpush1.msra.mxu1 %v1594_v57 }
 0x46a   :  { %1712 = vmatprep.subr.mxu1 %v2111_v1 }
 0x46b   :  { %1713 = vmatpush1.msra.mxu1 %v1593_v7 }
 0x46c   :  { %1714 = vmatprep.subr.mxu1 %v2111_v1 }
 0x46d   :  { %1715 = vmatpush1.msra.mxu1 %v1592_v56 }
 0x46e   :  { %1716 = vmatprep.subr.mxu1 %v2111_v1 }
 0x46f   :  { %1717 = vmatpush1.msra.mxu1 %v1591_v62 }
 0x470   :  { %1718 = vmatprep.subr.mxu1 %v2111_v1 }
 0x471   :  { %1719 = vmatpush1.msra.mxu1 %v1590_v35 }
 0x472   :  { %1720 = vmatprep.subr.mxu1 %v2111_v1 }
 0x473   :  { %1721 = vmatpush1.msra.mxu1 %v1589_v15 }
 0x474   :  { %1722 = vmatprep.subr.mxu1 %v2111_v1 }
 0x475   :  { %1723 = vmatpush1.msra.mxu1 %v1588_v11 }
 0x476   :  { %1724 = vmatprep.subr.mxu1 %v2111_v1 }
 0x477   :  { %1725 = vmatpush1.msra.mxu1 %v1587_v50 }
 0x478   :  { %1726 = vmatprep.subr.mxu1 %v2111_v1 }
 0x479   :  { %1727 = vmatpush1.msra.mxu1 %v1586_v17 }
 0x47a   :  { %1728 = vmatprep.subr.mxu1 %v2111_v1 }
 0x47b   :  { %1729 = vmatpush1.msra.mxu1 %v1585_v24 }
 0x47c   :  { %1730 = vmatprep.subr.mxu1 %v2111_v1 }
 0x47d   :  { %1731 = vmatpush1.msra.mxu1 %v1584_v28 }
 0x47e   :  { %1760 = vmatprep.subr.mxu1 %v2111_v1 }
 0x47f   :  { %1761 = vmatpush2.msra.mxu1 %v1601_v13 }
 0x480   :  { %1762 = vmatprep.subr.mxu1 %v2111_v1 }
 0x481   :  { %1763 = vmatpush2.msra.mxu1 %v1600_v20 }
 0x482   :  { %1765 = vmatmul.mubr.f32.vlgmr.msra.gmra.mxu1 %v1621_v39 }
 0x51e   :  { %v1914_v30 = vpop.f32.mrf.mxu1 }
 0x520   :  { %v1915_v5 = vpop.f32.mrf.mxu1 }
 0x521   :  { %v1916_v33 = vadd.f32 %v1915_v5, %v1914_v30 }
 0x523   :  { %v1697_v34 = vadd.f32 %v1916_v33, %v1605_v9 }
 0x542   :  { %v1766_v63 = vpop.f32.mrf.mxu1 }
 0x543   :  { %v1767_v10 = vadd.f32 %v1766_v63, %v1697_v34 }
 0x544   :  { %v1768_v23 = vpop.f32.mrf.mxu1 }
 0x545   :  { %v1770_v8 = vmul.f32 0.5, %v1767_v10 }
 0x547   :  { %2086 = vtanh.f32 %v1770_v8 }
 0x554   :  { %v2087_v4 = vpop.eup %2086 }
 0x555   :  { %v1772_v44 = vmul.f32 0.5, %v2087_v4 }
 0x557   :  { %v1773_v1 = vadd.f32 0.5, %v1772_v44 }
 0x559   :  { %1774 = vst.msk [vmem:[#allocation4] sm:$0x3] %vm3461_vm6, %v1773_v1 }
 0x55a   :  { %2100 = shalt.err (!%p2097_p4)
}
 0x55b   :  { %1784 = dma.vmem_to_hbm [thread:$0]  %s1782_s30, 32, %s3401_s5, [#allocation5]  }
 0x55c   :  { %2109 = dma.done.wait [#allocation5], 32  }
 0x55d   :  { %2110 = vsyncadd [#allocation5], 4294967264 }
 0x55e   :  { %1788 = vsyncpa [#allocation5], 1 }

</bundles_post_ra>
